<compile_context>
chip_gen: v7x
topology: tpu7x:2x2x1
jax: 0.10.0
libtpu: 0.0.40
codegen_flags: <defaults>
</compile_context>

<pallas_src>
import math
import functools

import numpy as np
import jax
import jax.numpy as jnp
from jax import lax
from jax.experimental import pallas as pl
from jax.experimental.pallas import tpu as pltpu


def _bilinear_matrix(n_in: int, n_out: int) -> np.ndarray:
    """Dense 1-D bilinear interpolation matrix, align_corners=True semantics."""
    A = np.zeros((n_out, n_in), dtype=np.float32)
    if n_in == 1:
        A[:, 0] = 1.0
        return A
    scale = (n_in - 1) / (n_out - 1)
    for p in range(n_out):
        s = p * scale
        i0 = min(int(math.floor(s)), n_in - 1)
        i1 = min(i0 + 1, n_in - 1)
        f = s - i0
        A[p, i0] += 1.0 - f
        A[p, i1] += f
    return A


def _tap_masks(h2: int, w2: int) -> np.ndarray:
    """[9, h2*w2] 0/1 mask: zero where conv tap k of output pixel (i2, j2)
    would read the 1-pixel zero-padding border (discards lane-wrapped values)."""
    ii, jj = np.meshgrid(np.arange(h2), np.arange(w2), indexing="ij")
    ii = ii.reshape(-1)
    jj = jj.reshape(-1)
    m = np.zeros((9, h2 * w2), dtype=np.float32)
    for k in range(9):
        kh, kw = k // 3, k % 3
        valid = ((ii + kh - 1 >= 0) & (ii + kh - 1 < h2) &
                 (jj + kw - 1 >= 0) & (jj + kw - 1 < w2))
        m[k] = valid.astype(np.float32)
    return m


def _pick_block_n(n: int, cin: int, cout: int, m_target: int = 128) -> int:
    """Largest divisor of n whose batched-M (block_n*Cin) stays <= the MXU row
    target while keeping the x/out block sublane dims 8-aligned."""
    divisors = [d for d in range(1, n + 1) if n % d == 0]

    def aligned(d):
        return (((d * cin) % 8 == 0 or d == n) and
                ((d * cout) % 8 == 0 or d == n))

    good = [d for d in divisors if aligned(d) and d * cin <= m_target]
    if not good:
        good = [d for d in divisors if aligned(d)] or divisors
    return max(good)


def _upconv_kernel(x_ref, kt_ref, mask_ref, w_ref, b_ref, out_ref, col_ref,
                   *, block_n, cin, cout, hw2, shifts):
    """x:[block_n*Cin, HW]  kt:[HW, HW2]  mask:[9, HW2]  w:[Cout, 9*Cin]
       b:[Cout, 1]  out:[block_n*Cout, HW2]  col scratch:[9*Cin, block_n*HW2]"""
    # ---- bilinear x2 upsample: ONE batched MXU matmul over the sample block -
    u = jnp.dot(x_ref[...], kt_ref[...],
                preferred_element_type=jnp.float32)       # [block_n*Cin, HW2]

    # ---- im2col: 9 taps via lane rotation (XLU); border mask folded into the
    # ---- tap store; per-sample slabs scattered along the col lane axis ------
    for k, s in enumerate(shifts):
        if s == 0:
            tap = u                                        # center tap: always valid
        else:
            tap = pltpu.roll(u, (-s) % hw2, 1) * mask_ref[k:k + 1, :]
        tap = tap.astype(col_ref.dtype)
        for n in range(block_n):
            col_ref[k * cin:(k + 1) * cin, n * hw2:(n + 1) * hw2] = (
                tap[n * cin:(n + 1) * cin, :])

    # ---- 3x3 conv: ONE [Cout, 9*Cin] @ [9*Cin, block_n*HW2] matmul + bias ---
    acc = jnp.dot(w_ref[...], col_ref[...],
                  preferred_element_type=jnp.float32) + b_ref[...]

    # ---- scatter back to the lane-dense [block_n*Cout, HW2] output ----------
    for n in range(block_n):
        out_ref[n * cout:(n + 1) * cout, :] = (
            acc[:, n * hw2:(n + 1) * hw2].astype(out_ref.dtype))


def upconv_pallas(x, weight, bias, *, block_n=None, compute_dtype=jnp.float32):
    """UpConv forward. x: [N,Cin,H,W]; weight: [Cout,Cin,3,3]; bias: [Cout].

    compute_dtype=jnp.bfloat16 halves operand HBM/VMEM traffic and unlocks the
    fast MXU path on v6e/v7x (accumulation stays f32), but needs looser test
    tolerances (~1e-3); default f32 keeps tight tolerances and v5e-friendly
    elementwise math."""
    N, Cin, H, W = x.shape
    Cout = weight.shape[0]
    H2, W2 = 2 * H, 2 * W
    HW, HW2 = H * W, H2 * W2

    if block_n is None:
        # Note: on v7x prefer N//block_n >= 2 so the "parallel" batch axis
        # feeds both TensorCores; balanced here against MXU M-fill.
        block_n = _pick_block_n(N, Cin, Cout)
    assert N % block_n == 0, "block_n must divide batch"

    # Host-side precompute: separable bilinear -> single Kronecker operator.
    ah = _bilinear_matrix(H, H2)                                   # [H2, H]
    aw = _bilinear_matrix(W, W2)                                   # [W2, W]
    kt = jnp.asarray(np.kron(ah, aw).T, dtype=compute_dtype)       # [HW, HW2]
    mask = jnp.asarray(_tap_masks(H2, W2))                         # [9, HW2] f32
    w_mat = jnp.transpose(weight, (0, 2, 3, 1)).reshape(Cout, 9 * Cin)
    w_mat = w_mat.astype(compute_dtype)                            # [Cout, 9*Cin]
    b2 = bias.reshape(Cout, 1).astype(jnp.float32)                 # [Cout, 1]
    x_flat = x.reshape(N * Cin, HW).astype(compute_dtype)          # lane-dense

    # Flat-index shift of tap (kh, kw) relative to the output pixel.
    shifts = tuple((kh - 1) * W2 + (kw - 1)
                   for kh in range(3) for kw in range(3))

    grid_spec = pltpu.PrefetchScalarGridSpec(
        num_scalar_prefetch=0,
        grid=(N // block_n,),
        in_specs=[
            pl.BlockSpec((block_n * Cin, HW), lambda g: (g, 0)),
            pl.BlockSpec((HW, HW2), lambda g: (0, 0)),
            pl.BlockSpec((9, HW2), lambda g: (0, 0)),
            pl.BlockSpec((Cout, 9 * Cin), lambda g: (0, 0)),
            pl.BlockSpec((Cout, 1), lambda g: (0, 0)),
        ],
        out_specs=pl.BlockSpec((block_n * Cout, HW2), lambda g: (g, 0)),
        scratch_shapes=[pltpu.VMEM((9 * Cin, block_n * HW2), compute_dtype)],
    )
    out_flat = pl.pallas_call(
        functools.partial(_upconv_kernel, block_n=block_n, cin=Cin, cout=Cout,
                          hw2=HW2, shifts=shifts),
        out_shape=jax.ShapeDtypeStruct((N * Cout, HW2), jnp.float32),
        grid_spec=grid_spec,
        compiler_params=pltpu.CompilerParams(
            dimension_semantics=("parallel",)),
    )(x_flat, kt, mask, w_mat, b2)

    # Lane-dense in the kernel; back to NCHW outside.
    return out_flat.reshape(N, Cout, H2, W2)


def upconv_reference(x, weight, bias):
    """Pure-JAX reference: align_corners=True bilinear x2 + 3x3 conv, pad 1."""
    N, Cin, H, W = x.shape
    H2, W2 = 2 * H, 2 * W
    ah = jnp.asarray(_bilinear_matrix(H, H2))
    aw = jnp.asarray(_bilinear_matrix(W, W2))
    u = jnp.einsum('ph,nchw,qw->ncpq', ah, x, aw)
    out = lax.conv_general_dilated(
        u, weight, window_strides=(1, 1), padding=((1, 1), (1, 1)),
        dimension_numbers=('NCHW', 'OIHW', 'NCHW'))
    return out + bias[None, :, None, None]


if __name__ == "__main__":
    N, Cin, Cout, H, W = 2, 4, 8, 16, 16
    key = jax.random.PRNGKey(0)
    kx, kw_, kb = jax.random.split(key, 3)
    x = jax.random.normal(kx, (N, Cin, H, W), dtype=jnp.float32)
    # deterministic synthetic Conv2d(inc=4, outc=8, 3, padding=1) params
    weight = jax.random.normal(kw_, (Cout, Cin, 3, 3),
                               dtype=jnp.float32) / math.sqrt(Cin * 9)
    bias = jax.random.normal(kb, (Cout,), dtype=jnp.float32) * 0.1

    out = jax.block_until_ready(upconv_pallas(x, weight, bias))
    assert out.shape == (N, Cout, 2 * H, 2 * W)

    ref = upconv_reference(x, weight, bias)
    np.testing.assert_allclose(np.asarray(out), np.asarray(ref),
                               rtol=1e-4, atol=1e-4)
    print("KERNEL_OK")
</pallas_src>

<mosaic_0001>
module attributes {stable_mosaic.version = 11 : i64} {
  func.func @_upconv_kernel(%arg0: i32, %arg1: memref<8x256xf32, #tpu.memory_space<vmem>>, %arg2: memref<256x1024xf32, #tpu.memory_space<vmem>>, %arg3: memref<9x1024xf32, #tpu.memory_space<vmem>>, %arg4: memref<8x36xf32, #tpu.memory_space<vmem>>, %arg5: memref<8x1xf32, #tpu.memory_space<vmem>>, %arg6: memref<16x1024xf32, #tpu.memory_space<vmem>>, %arg7: memref<36x2048xf32, #tpu.memory_space<vmem>>) attributes {dimension_semantics = [#tpu.dimension_semantics<parallel>], iteration_bounds = array<i64: 1>, scalar_prefetch = 0 : i64, scratch_operands = 1 : i64, tpu.core_type = #tpu.core_type<tc>, window_params = [{transform_indices = @transform_0, window_bounds = array<i64: 8, 256>}, {pipeline_mode = #tpu.pipeline_mode<synchronous>, transform_indices = @transform_1, window_bounds = array<i64: 256, 1024>}, {pipeline_mode = #tpu.pipeline_mode<synchronous>, transform_indices = @transform_2, window_bounds = array<i64: 9, 1024>}, {pipeline_mode = #tpu.pipeline_mode<synchronous>, transform_indices = @transform_3, window_bounds = array<i64: 8, 36>}, {pipeline_mode = #tpu.pipeline_mode<synchronous>, transform_indices = @transform_4, window_bounds = array<i64: 8, 1>}, {transform_indices = @transform_5, window_bounds = array<i64: 16, 1024>}]} {
    %c0 = arith.constant 0 : index
    %c0_0 = arith.constant 0 : index
    %0 = vector.load %arg1[%c0, %c0_0] : memref<8x256xf32, #tpu.memory_space<vmem>>, vector<8x256xf32>
    %c0_1 = arith.constant 0 : index
    %c0_2 = arith.constant 0 : index
    %1 = vector.load %arg2[%c0_1, %c0_2] : memref<256x1024xf32, #tpu.memory_space<vmem>>, vector<256x1024xf32>
    %cst = arith.constant dense<0.000000e+00> : vector<8x1024xf32>
    %2 = tpu.matmul %0, %1, %cst {dimension_numbers = #tpu.dot_dimension_numbers<[1], [0], [0], [1], [0, 0, 1, 1], [], []>} : vector<8x256xf32>, vector<256x1024xf32>, vector<8x1024xf32> -> vector<8x1024xf32>
    %c33_i32 = arith.constant 33 : i32
    %3 = tpu.dynamic_rotate %2 by %c33_i32 dim 1 : vector<8x1024xf32>, i32 -> vector<8x1024xf32>
    %c0_3 = arith.constant 0 : index
    %c0_4 = arith.constant 0 : index
    %4 = vector.load %arg3[%c0_3, %c0_4] : memref<9x1024xf32, #tpu.memory_space<vmem>>, vector<1x1024xf32>
    %5 = vector.broadcast %4 : vector<1x1024xf32> to vector<8x1024xf32>
    %6 = arith.mulf %3, %5 : vector<8x1024xf32>
    %7 = vector.extract_strided_slice %6 {offsets = [0, 0], sizes = [4, 1024], strides = [1, 1]} : vector<8x1024xf32> to vector<4x1024xf32>
    %c0_5 = arith.constant 0 : index
    %c0_6 = arith.constant 0 : index
    %8 = vector.load %arg7[%c0_5, %c0_6] : memref<36x2048xf32, #tpu.memory_space<vmem>>, vector<4x1024xf32>
    tpu.vector_store %arg7[%c0_5, %c0_6], %7 {strides = array<i32>} : memref<36x2048xf32, #tpu.memory_space<vmem>>, vector<4x1024xf32>,
    %9 = vector.extract_strided_slice %6 {offsets = [4, 0], sizes = [4, 1024], strides = [1, 1]} : vector<8x1024xf32> to vector<4x1024xf32>
    %c0_7 = arith.constant 0 : index
    %c1024 = arith.constant 1024 : index
    %10 = vector.load %arg7[%c0_7, %c1024] : memref<36x2048xf32, #tpu.memory_space<vmem>>, vector<4x1024xf32>
    tpu.vector_store %arg7[%c0_7, %c1024], %9 {strides = array<i32>} : memref<36x2048xf32, #tpu.memory_space<vmem>>, vector<4x1024xf32>,
    %c32_i32 = arith.constant 32 : i32
    %11 = tpu.dynamic_rotate %2 by %c32_i32 dim 1 : vector<8x1024xf32>, i32 -> vector<8x1024xf32>
    %c1 = arith.constant 1 : index
    %c0_8 = arith.constant 0 : index
    %12 = vector.load %arg3[%c1, %c0_8] : memref<9x1024xf32, #tpu.memory_space<vmem>>, vector<1x1024xf32>
    %13 = vector.broadcast %12 : vector<1x1024xf32> to vector<8x1024xf32>
    %14 = arith.mulf %11, %13 : vector<8x1024xf32>
    %15 = vector.extract_strided_slice %14 {offsets = [0, 0], sizes = [4, 1024], strides = [1, 1]} : vector<8x1024xf32> to vector<4x1024xf32>
    %c4 = arith.constant 4 : index
    %c0_9 = arith.constant 0 : index
    %16 = vector.load %arg7[%c4, %c0_9] : memref<36x2048xf32, #tpu.memory_space<vmem>>, vector<4x1024xf32>
    tpu.vector_store %arg7[%c4, %c0_9], %15 {strides = array<i32>} : memref<36x2048xf32, #tpu.memory_space<vmem>>, vector<4x1024xf32>,
    %17 = vector.extract_strided_slice %14 {offsets = [4, 0], sizes = [4, 1024], strides = [1, 1]} : vector<8x1024xf32> to vector<4x1024xf32>
    %c4_10 = arith.constant 4 : index
    %c1024_11 = arith.constant 1024 : index
    %18 = vector.load %arg7[%c4_10, %c1024_11] : memref<36x2048xf32, #tpu.memory_space<vmem>>, vector<4x1024xf32>
    tpu.vector_store %arg7[%c4_10, %c1024_11], %17 {strides = array<i32>} : memref<36x2048xf32, #tpu.memory_space<vmem>>, vector<4x1024xf32>,
    %c31_i32 = arith.constant 31 : i32
    %19 = tpu.dynamic_rotate %2 by %c31_i32 dim 1 : vector<8x1024xf32>, i32 -> vector<8x1024xf32>
    %c2 = arith.constant 2 : index
    %c0_12 = arith.constant 0 : index
    %20 = vector.load %arg3[%c2, %c0_12] : memref<9x1024xf32, #tpu.memory_space<vmem>>, vector<1x1024xf32>
    %21 = vector.broadcast %20 : vector<1x1024xf32> to vector<8x1024xf32>
    %22 = arith.mulf %19, %21 : vector<8x1024xf32>
    %23 = vector.extract_strided_slice %22 {offsets = [0, 0], sizes = [4, 1024], strides = [1, 1]} : vector<8x1024xf32> to vector<4x1024xf32>
    %c8 = arith.constant 8 : index
    %c0_13 = arith.constant 0 : index
    %24 = vector.load %arg7[%c8, %c0_13] : memref<36x2048xf32, #tpu.memory_space<vmem>>, vector<4x1024xf32>
    tpu.vector_store %arg7[%c8, %c0_13], %23 {strides = array<i32>} : memref<36x2048xf32, #tpu.memory_space<vmem>>, vector<4x1024xf32>,
    %25 = vector.extract_strided_slice %22 {offsets = [4, 0], sizes = [4, 1024], strides = [1, 1]} : vector<8x1024xf32> to vector<4x1024xf32>
    %c8_14 = arith.constant 8 : index
    %c1024_15 = arith.constant 1024 : index
    %26 = vector.load %arg7[%c8_14, %c1024_15] : memref<36x2048xf32, #tpu.memory_space<vmem>>, vector<4x1024xf32>
    tpu.vector_store %arg7[%c8_14, %c1024_15], %25 {strides = array<i32>} : memref<36x2048xf32, #tpu.memory_space<vmem>>, vector<4x1024xf32>,
    %c1_i32 = arith.constant 1 : i32
    %27 = tpu.dynamic_rotate %2 by %c1_i32 dim 1 : vector<8x1024xf32>, i32 -> vector<8x1024xf32>
    %c3 = arith.constant 3 : index
    %c0_16 = arith.constant 0 : index
    %28 = vector.load %arg3[%c3, %c0_16] : memref<9x1024xf32, #tpu.memory_space<vmem>>, vector<1x1024xf32>
    %29 = vector.broadcast %28 : vector<1x1024xf32> to vector<8x1024xf32>
    %30 = arith.mulf %27, %29 : vector<8x1024xf32>
    %31 = vector.extract_strided_slice %30 {offsets = [0, 0], sizes = [4, 1024], strides = [1, 1]} : vector<8x1024xf32> to vector<4x1024xf32>
    %c12 = arith.constant 12 : index
    %c0_17 = arith.constant 0 : index
    %32 = vector.load %arg7[%c12, %c0_17] : memref<36x2048xf32, #tpu.memory_space<vmem>>, vector<4x1024xf32>
    tpu.vector_store %arg7[%c12, %c0_17], %31 {strides = array<i32>} : memref<36x2048xf32, #tpu.memory_space<vmem>>, vector<4x1024xf32>,
    %33 = vector.extract_strided_slice %30 {offsets = [4, 0], sizes = [4, 1024], strides = [1, 1]} : vector<8x1024xf32> to vector<4x1024xf32>
    %c12_18 = arith.constant 12 : index
    %c1024_19 = arith.constant 1024 : index
    %34 = vector.load %arg7[%c12_18, %c1024_19] : memref<36x2048xf32, #tpu.memory_space<vmem>>, vector<4x1024xf32>
    tpu.vector_store %arg7[%c12_18, %c1024_19], %33 {strides = array<i32>} : memref<36x2048xf32, #tpu.memory_space<vmem>>, vector<4x1024xf32>,
    %35 = vector.extract_strided_slice %2 {offsets = [0, 0], sizes = [4, 1024], strides = [1, 1]} : vector<8x1024xf32> to vector<4x1024xf32>
    %c16 = arith.constant 16 : index
    %c0_20 = arith.constant 0 : index
    %36 = vector.load %arg7[%c16, %c0_20] : memref<36x2048xf32, #tpu.memory_space<vmem>>, vector<4x1024xf32>
    tpu.vector_store %arg7[%c16, %c0_20], %35 {strides = array<i32>} : memref<36x2048xf32, #tpu.memory_space<vmem>>, vector<4x1024xf32>,
    %37 = vector.extract_strided_slice %2 {offsets = [4, 0], sizes = [4, 1024], strides = [1, 1]} : vector<8x1024xf32> to vector<4x1024xf32>
    %c16_21 = arith.constant 16 : index
    %c1024_22 = arith.constant 1024 : index
    %38 = vector.load %arg7[%c16_21, %c1024_22] : memref<36x2048xf32, #tpu.memory_space<vmem>>, vector<4x1024xf32>
    tpu.vector_store %arg7[%c16_21, %c1024_22], %37 {strides = array<i32>} : memref<36x2048xf32, #tpu.memory_space<vmem>>, vector<4x1024xf32>,
    %c1023_i32 = arith.constant 1023 : i32
    %39 = tpu.dynamic_rotate %2 by %c1023_i32 dim 1 : vector<8x1024xf32>, i32 -> vector<8x1024xf32>
    %c5 = arith.constant 5 : index
    %c0_23 = arith.constant 0 : index
    %40 = vector.load %arg3[%c5, %c0_23] : memref<9x1024xf32, #tpu.memory_space<vmem>>, vector<1x1024xf32>
    %41 = vector.broadcast %40 : vector<1x1024xf32> to vector<8x1024xf32>
    %42 = arith.mulf %39, %41 : vector<8x1024xf32>
    %43 = vector.extract_strided_slice %42 {offsets = [0, 0], sizes = [4, 1024], strides = [1, 1]} : vector<8x1024xf32> to vector<4x1024xf32>
    %c20 = arith.constant 20 : index
    %c0_24 = arith.constant 0 : index
    %44 = vector.load %arg7[%c20, %c0_24] : memref<36x2048xf32, #tpu.memory_space<vmem>>, vector<4x1024xf32>
    tpu.vector_store %arg7[%c20, %c0_24], %43 {strides = array<i32>} : memref<36x2048xf32, #tpu.memory_space<vmem>>, vector<4x1024xf32>,
    %45 = vector.extract_strided_slice %42 {offsets = [4, 0], sizes = [4, 1024], strides = [1, 1]} : vector<8x1024xf32> to vector<4x1024xf32>
    %c20_25 = arith.constant 20 : index
    %c1024_26 = arith.constant 1024 : index
    %46 = vector.load %arg7[%c20_25, %c1024_26] : memref<36x2048xf32, #tpu.memory_space<vmem>>, vector<4x1024xf32>
    tpu.vector_store %arg7[%c20_25, %c1024_26], %45 {strides = array<i32>} : memref<36x2048xf32, #tpu.memory_space<vmem>>, vector<4x1024xf32>,
    %c993_i32 = arith.constant 993 : i32
    %47 = tpu.dynamic_rotate %2 by %c993_i32 dim 1 : vector<8x1024xf32>, i32 -> vector<8x1024xf32>
    %c6 = arith.constant 6 : index
    %c0_27 = arith.constant 0 : index
    %48 = vector.load %arg3[%c6, %c0_27] : memref<9x1024xf32, #tpu.memory_space<vmem>>, vector<1x1024xf32>
    %49 = vector.broadcast %48 : vector<1x1024xf32> to vector<8x1024xf32>
    %50 = arith.mulf %47, %49 : vector<8x1024xf32>
    %51 = vector.extract_strided_slice %50 {offsets = [0, 0], sizes = [4, 1024], strides = [1, 1]} : vector<8x1024xf32> to vector<4x1024xf32>
    %c24 = arith.constant 24 : index
    %c0_28 = arith.constant 0 : index
    %52 = vector.load %arg7[%c24, %c0_28] : memref<36x2048xf32, #tpu.memory_space<vmem>>, vector<4x1024xf32>
    tpu.vector_store %arg7[%c24, %c0_28], %51 {strides = array<i32>} : memref<36x2048xf32, #tpu.memory_space<vmem>>, vector<4x1024xf32>,
    %53 = vector.extract_strided_slice %50 {offsets = [4, 0], sizes = [4, 1024], strides = [1, 1]} : vector<8x1024xf32> to vector<4x1024xf32>
    %c24_29 = arith.constant 24 : index
    %c1024_30 = arith.constant 1024 : index
    %54 = vector.load %arg7[%c24_29, %c1024_30] : memref<36x2048xf32, #tpu.memory_space<vmem>>, vector<4x1024xf32>
    tpu.vector_store %arg7[%c24_29, %c1024_30], %53 {strides = array<i32>} : memref<36x2048xf32, #tpu.memory_space<vmem>>, vector<4x1024xf32>,
    %c992_i32 = arith.constant 992 : i32
    %55 = tpu.dynamic_rotate %2 by %c992_i32 dim 1 : vector<8x1024xf32>, i32 -> vector<8x1024xf32>
    %c7 = arith.constant 7 : index
    %c0_31 = arith.constant 0 : index
    %56 = vector.load %arg3[%c7, %c0_31] : memref<9x1024xf32, #tpu.memory_space<vmem>>, vector<1x1024xf32>
    %57 = vector.broadcast %56 : vector<1x1024xf32> to vector<8x1024xf32>
    %58 = arith.mulf %55, %57 : vector<8x1024xf32>
    %59 = vector.extract_strided_slice %58 {offsets = [0, 0], sizes = [4, 1024], strides = [1, 1]} : vector<8x1024xf32> to vector<4x1024xf32>
    %c28 = arith.constant 28 : index
    %c0_32 = arith.constant 0 : index
    %60 = vector.load %arg7[%c28, %c0_32] : memref<36x2048xf32, #tpu.memory_space<vmem>>, vector<4x1024xf32>
    tpu.vector_store %arg7[%c28, %c0_32], %59 {strides = array<i32>} : memref<36x2048xf32, #tpu.memory_space<vmem>>, vector<4x1024xf32>,
    %61 = vector.extract_strided_slice %58 {offsets = [4, 0], sizes = [4, 1024], strides = [1, 1]} : vector<8x1024xf32> to vector<4x1024xf32>
    %c28_33 = arith.constant 28 : index
    %c1024_34 = arith.constant 1024 : index
    %62 = vector.load %arg7[%c28_33, %c1024_34] : memref<36x2048xf32, #tpu.memory_space<vmem>>, vector<4x1024xf32>
    tpu.vector_store %arg7[%c28_33, %c1024_34], %61 {strides = array<i32>} : memref<36x2048xf32, #tpu.memory_space<vmem>>, vector<4x1024xf32>,
    %c991_i32 = arith.constant 991 : i32
    %63 = tpu.dynamic_rotate %2 by %c991_i32 dim 1 : vector<8x1024xf32>, i32 -> vector<8x1024xf32>
    %c8_35 = arith.constant 8 : index
    %c0_36 = arith.constant 0 : index
    %64 = vector.load %arg3[%c8_35, %c0_36] : memref<9x1024xf32, #tpu.memory_space<vmem>>, vector<1x1024xf32>
    %65 = vector.broadcast %64 : vector<1x1024xf32> to vector<8x1024xf32>
    %66 = arith.mulf %63, %65 : vector<8x1024xf32>
    %67 = vector.extract_strided_slice %66 {offsets = [0, 0], sizes = [4, 1024], strides = [1, 1]} : vector<8x1024xf32> to vector<4x1024xf32>
    %c32 = arith.constant 32 : index
    %c0_37 = arith.constant 0 : index
    %68 = vector.load %arg7[%c32, %c0_37] : memref<36x2048xf32, #tpu.memory_space<vmem>>, vector<4x1024xf32>
    tpu.vector_store %arg7[%c32, %c0_37], %67 {strides = array<i32>} : memref<36x2048xf32, #tpu.memory_space<vmem>>, vector<4x1024xf32>,
    %69 = vector.extract_strided_slice %66 {offsets = [4, 0], sizes = [4, 1024], strides = [1, 1]} : vector<8x1024xf32> to vector<4x1024xf32>
    %c32_38 = arith.constant 32 : index
    %c1024_39 = arith.constant 1024 : index
    %70 = vector.load %arg7[%c32_38, %c1024_39] : memref<36x2048xf32, #tpu.memory_space<vmem>>, vector<4x1024xf32>
    tpu.vector_store %arg7[%c32_38, %c1024_39], %69 {strides = array<i32>} : memref<36x2048xf32, #tpu.memory_space<vmem>>, vector<4x1024xf32>,
    %c0_40 = arith.constant 0 : index
    %c0_41 = arith.constant 0 : index
    %71 = vector.load %arg4[%c0_40, %c0_41] : memref<8x36xf32, #tpu.memory_space<vmem>>, vector<8x36xf32>
    %c0_42 = arith.constant 0 : index
    %c0_43 = arith.constant 0 : index
    %72 = vector.load %arg7[%c0_42, %c0_43] : memref<36x2048xf32, #tpu.memory_space<vmem>>, vector<36x2048xf32>
    %cst_44 = arith.constant dense<0.000000e+00> : vector<8x2048xf32>
    %73 = tpu.matmul %71, %72, %cst_44 {dimension_numbers = #tpu.dot_dimension_numbers<[1], [0], [0], [1], [0, 0, 1, 1], [], []>} : vector<8x36xf32>, vector<36x2048xf32>, vector<8x2048xf32> -> vector<8x2048xf32>
    %c0_45 = arith.constant 0 : index
    %c0_46 = arith.constant 0 : index
    %74 = vector.load %arg5[%c0_45, %c0_46] : memref<8x1xf32, #tpu.memory_space<vmem>>, vector<8x1xf32>
    %75 = vector.broadcast %74 : vector<8x1xf32> to vector<8x2048xf32>
    %76 = arith.addf %73, %75 : vector<8x2048xf32>
    %77 = vector.extract_strided_slice %76 {offsets = [0, 0], sizes = [8, 1024], strides = [1, 1]} : vector<8x2048xf32> to vector<8x1024xf32>
    %c0_47 = arith.constant 0 : index
    %c0_48 = arith.constant 0 : index
    %78 = vector.load %arg6[%c0_47, %c0_48] : memref<16x1024xf32, #tpu.memory_space<vmem>>, vector<8x1024xf32>
    tpu.vector_store %arg6[%c0_47, %c0_48], %77 {strides = array<i32>} : memref<16x1024xf32, #tpu.memory_space<vmem>>, vector<8x1024xf32>,
    %79 = vector.extract_strided_slice %76 {offsets = [0, 1024], sizes = [8, 1024], strides = [1, 1]} : vector<8x2048xf32> to vector<8x1024xf32>
    %c8_49 = arith.constant 8 : index
    %c0_50 = arith.constant 0 : index
    %80 = vector.load %arg6[%c8_49, %c0_50] : memref<16x1024xf32, #tpu.memory_space<vmem>>, vector<8x1024xf32>
    tpu.vector_store %arg6[%c8_49, %c0_50], %79 {strides = array<i32>} : memref<16x1024xf32, #tpu.memory_space<vmem>>, vector<8x1024xf32>,
    return
  }
  func.func @transform_0(%arg0: i32) -> (i32, i32) {
    %c0_i32 = arith.constant 0 : i32
    %c0_i32_0 = arith.constant 0 : i32
    return %arg0, %c0_i32 : i32, i32
  }
  func.func @transform_1(%arg0: i32) -> (i32, i32) {
    %c0_i32 = arith.constant 0 : i32
    %c0_i32_0 = arith.constant 0 : i32
    %c0_i32_1 = arith.constant 0 : i32
    return %c0_i32, %c0_i32_0 : i32, i32
  }
  func.func @transform_2(%arg0: i32) -> (i32, i32) {
    %c0_i32 = arith.constant 0 : i32
    %c0_i32_0 = arith.constant 0 : i32
    %c0_i32_1 = arith.constant 0 : i32
    return %c0_i32, %c0_i32_0 : i32, i32
  }
  func.func @transform_3(%arg0: i32) -> (i32, i32) {
    %c0_i32 = arith.constant 0 : i32
    %c0_i32_0 = arith.constant 0 : i32
    %c0_i32_1 = arith.constant 0 : i32
    return %c0_i32, %c0_i32_0 : i32, i32
  }
  func.func @transform_4(%arg0: i32) -> (i32, i32) {
    %c0_i32 = arith.constant 0 : i32
    %c0_i32_0 = arith.constant 0 : i32
    %c0_i32_1 = arith.constant 0 : i32
    return %c0_i32, %c0_i32_0 : i32, i32
  }
  func.func @transform_5(%arg0: i32) -> (i32, i32) {
    %c0_i32 = arith.constant 0 : i32
    %c0_i32_0 = arith.constant 0 : i32
    return %arg0, %c0_i32 : i32, i32
  }
}

</mosaic_0001>

<bundles_post_ra>
// kernel: tpu_custom_call.1
= control target key start
LH: loop header
LB: loop body
LE: loop exit
PB: predicated region body
PF: predicated region fallthrough
CT: control target
= control target key end

     0   :  { %10 = vsyncpa [#allocation4], 0  ;;  %s3479_s0 = inlined_call_operand.hbm [shape: f32[8,256], index: 0, kind: input, shape index: {}]   ;;  %s3480_s1 = inlined_call_operand.hbm [shape: f32[256,1024], index: 1, kind: input, shape index: {}]   ;;  %s3481_s2 = inlined_call_operand.hbm [shape: f32[9,1024], index: 2, kind: input, shape index: {}]   ;;  %s3482_s3 = inlined_call_operand.vmem [shape: f32[8,36], index: 3, kind: input, shape index: {}]   ;;  %s3483_s4 = inlined_call_operand.vmem [shape: f32[8,1], index: 4, kind: input, shape index: {}]   ;;  %s3484_s5 = inlined_call_operand.hbm [shape: f32[16,1024], index: 5, kind: output, shape index: {}]  }
   0x1   :  { %11 = vsyncpa [#allocation7], 0 }
   0x2   :  { %12 = vsyncpa [#allocation5], 0  ;;  %s2784_s18 = smov [#allocation6]   ;;  %s2690_s22 = scalar_lea.hbm %s3480_s1, 32768 }
   0x3   :  { %s28_s19 = sshll.u32 %s2784_s18, 4  ;;  %p2691_p0 = scmp.ne.s32.totalorder %s3480_s1, %s2690_s22  ;;  %s29_s19 = int_to_ptr.vmem [resolvable:$true] %s28_s19 }
   0x4   :  { %p2694_p1 = scmp.lt.u32.totalorder %s2690_s22, %s3480_s1 }
   0x6   :  { %p2696_p2 = pnand %p2694_p1, %p2691_p0 }
   0x8   :  { %2699 = shalt.err (!%p2696_p2)
}
   0x9   :  { %s2700_s27 = scalar_lea.vmem %s29_s19, 32768  ;;  %p2705_p4 = scmp.lt.s32.totalorder %s29_s19, %s29_s19 }
   0xa   :  { %p2701_p3 = scmp.ne.s32.totalorder %s29_s19, %s2700_s27  ;;  %p2706_p5 = scmp.lt.s32.totalorder %s2700_s27, %s2700_s27 }
   0xc   :  { %p2707_p6 = por %p2706_p5, %p2705_p4 }
   0xe   :  { %p2708_p7 = pnand %p2707_p6, %p2701_p3 }
  0x10   :  { %2711 = shalt.err (!%p2708_p7)
}
  0x11   :  { %s2785_s28 = smov 1024   ;;  %s2786_s29 = smov 64  }
  0x12   :  { %34 = dma.hbm_to_vmem [thread:$0]  %s3480_s1, 32768, %s29_s19, [#allocation7], %s2785_s28, %s2785_s28, %s2786_s29  }
  0x13   :  { %s2787_s7 = smov [#allocation3]   ;;  %s2788_s9 = smov [#allocation8]  }
  0x14   :  { %s19_s8 = sshll.u32 %s2787_s7, 4  ;;  %s40_s10 = sshll.u32 %s2788_s9, 4  ;;  %s20_s8 = int_to_ptr.vmem [resolvable:$true] %s19_s8  ;;  %s41_s10 = int_to_ptr.vmem [resolvable:$true] %s40_s10 }
  0x15   :  { %s2712_s13 = scalar_lea.hbm %s3479_s0, 256 }
  0x16   :  { %p2713_p8 = scmp.ne.s32.totalorder %s3479_s0, %s2712_s13  ;;  %p2716_p9 = scmp.lt.u32.totalorder %s2712_s13, %s3479_s0 }
  0x18   :  { %p2718_p10 = pnand %p2716_p9, %p2713_p8 }
  0x1a   :  { %2721 = shalt.err (!%p2718_p10)
}
  0x1b   :  { %s2722_s1 = scalar_lea.vmem %s20_s8, 256  ;;  %p2727_p12 = scmp.lt.s32.totalorder %s20_s8, %s20_s8 }
  0x1c   :  { %p2723_p11 = scmp.ne.s32.totalorder %s20_s8, %s2722_s1  ;;  %p2728_p13 = scmp.lt.s32.totalorder %s2722_s1, %s2722_s1 }
  0x1e   :  { %p2729_p0 = por %p2728_p13, %p2727_p12 }
  0x20   :  { %p2730_p1 = pnand %p2729_p0, %p2723_p11 }
  0x22   :  { %2733 = shalt.err (!%p2730_p1)
}
  0x23   :  { %22 = dma.hbm_to_vmem [thread:$0]  %s3479_s0, 256, %s20_s8, [#allocation4]  }
  0x24   :  { %s2734_s22 = scalar_lea.hbm %s3481_s2, 2048 }
  0x25   :  { %p2735_p2 = scmp.ne.s32.totalorder %s3481_s2, %s2734_s22  ;;  %p2738_p3 = scmp.lt.u32.totalorder %s2734_s22, %s3481_s2 }
  0x27   :  { %p2740_p4 = pnand %p2738_p3, %p2735_p2 }
  0x29   :  { %2743 = shalt.err (!%p2740_p4)
}
  0x2a   :  { %s2744_s27 = scalar_lea.vmem %s41_s10, 2048  ;;  %p2749_p6 = scmp.lt.s32.totalorder %s41_s10, %s41_s10 }
  0x2b   :  { %p2745_p5 = scmp.ne.s32.totalorder %s41_s10, %s2744_s27  ;;  %p2750_p7 = scmp.lt.s32.totalorder %s2744_s27, %s2744_s27 }
  0x2d   :  { %p2751_p8 = por %p2750_p7, %p2749_p6 }
  0x2f   :  { %p2752_p9 = pnand %p2751_p8, %p2745_p5 }
  0x31   :  { %2755 = shalt.err (!%p2752_p9)
}
  0x32   :  { %46 = dma.hbm_to_vmem [thread:$0]  %s3481_s2, 2048, %s41_s10, [#allocation7], %s2785_s28, %s2785_s28, %s2786_s29  }
  0x33   :  { %2778 = dma.done.wait [#allocation4], 256  }
  0x34   :  { %2779 = vsyncadd [#allocation4], 4294967040 }
  0x35   :  { %2780 = dma.done.wait [#allocation7], 34816  }
  0x36   :  { %2781 = vsyncadd [#allocation7], 4294932480  ;;  %v63_v0 = vld [vmem:[#allocation6 + $0x8] sm:$0xff]  ;;  %v65_v2 = vld [vmem:[#allocation6 + $0x18] sm:$0xff]  ;;  %s2789_s2 = smov 32   ;;  %s2790_s6 = smov 1  }
  0x37   :  { %v71_v1 = vld [vmem:[#allocation6 + $0x48] sm:$0xff]  ;;  %v73_v4 = vld [vmem:[#allocation6 + $0x58] sm:$0xff]  ;;  %v62_v5 = vld [vmem:[#allocation6] sm:$0xff]  ;;  %s2791_s7 = smov 127   ;;  %s2792_s8 = smov 96   ;;  %vm1678_vm8 = vcmask 1043456  }
  0x38   :  { %v2353_v3 = vpack.c.bf16 %v71_v1, %v63_v0  ;;  %v70_v6 = vld [vmem:[#allocation6 + $0x40] sm:$0xff]  ;;  %v2417_v7 = vpack.c.bf16 %v73_v4, %v65_v2  ;;  %v64_v9 = vld [vmem:[#allocation6 + $0x10] sm:$0xff]  ;;  %v79_v11 = vld [vmem:[#allocation6 + $0x88] sm:$0xff]  ;;  %s2793_s9 = smov 33   ;;  %s2794_s10 = smov 97   ;;  %vm1674_vm9 = vcmask 293888  }
  0x39   :  { %v2355_v8 = vpack.c.bf16 %v70_v6, %v62_v5  ;;  %v72_v10 = vld [vmem:[#allocation6 + $0x50] sm:$0xff]  ;;  %v87_v13 = vld [vmem:[#allocation6 + $0xc8] sm:$0xff]  ;;  %v81_v14 = vld [vmem:[#allocation6 + $0x98] sm:$0xff]  ;;  %s2795_s11 = smov 31   ;;  %s2796_s12 = smov 95  }
  0x3a   :  { %2354 = vmatprep.subr.bf16.mxu0 %v2353_v3  ;;  %v2419_v12 = vpack.c.bf16 %v72_v10, %v64_v9  ;;  %v89_v15 = vld [vmem:[#allocation6 + $0xd8] sm:$0xff]  ;;  %2418 = vmatprep.subr.bf16.mxu1 %v2417_v7  ;;  %v2357_v16 = vpack.c.bf16 %v87_v13, %v79_v11  ;;  %v78_v18 = vld [vmem:[#allocation6 + $0x80] sm:$0xff]  ;;  %v80_v20 = vld [vmem:[#allocation6 + $0x90] sm:$0xff] }
  0x3b   :  { %2356 = vmatpush1.bf16.msra.mxu0 %v2355_v8  ;;  %v2421_v17 = vpack.c.bf16 %v89_v15, %v81_v14  ;;  %v86_v19 = vld [vmem:[#allocation6 + $0xc0] sm:$0xff]  ;;  %v88_v22 = vld [vmem:[#allocation6 + $0xd0] sm:$0xff]  ;;  %v95_v23 = vld [vmem:[#allocation6 + $0x108] sm:$0xff] }
  0x3c   :  { %2420 = vmatpush1.bf16.msra.mxu1 %v2419_v12  ;;  %v2359_v21 = vpack.c.bf16 %v86_v19, %v78_v18  ;;  %v103_v24 = vld [vmem:[#allocation6 + $0x148] sm:$0xff]  ;;  %2358 = vmatprep.subr.bf16.mxu0 %v2357_v16  ;;  %v2423_v25 = vpack.c.bf16 %v88_v22, %v80_v20  ;;  %v97_v27 = vld [vmem:[#allocation6 + $0x118] sm:$0xff]  ;;  %v94_v29 = vld [vmem:[#allocation6 + $0x100] sm:$0xff] }
  0x3d   :  { %2422 = vmatprep.subr.bf16.mxu1 %v2421_v17  ;;  %v2361_v26 = vpack.c.bf16 %v103_v24, %v95_v23  ;;  %v105_v28 = vld [vmem:[#allocation6 + $0x158] sm:$0xff]  ;;  %v102_v31 = vld [vmem:[#allocation6 + $0x140] sm:$0xff]  ;;  %v96_v32 = vld [vmem:[#allocation6 + $0x110] sm:$0xff] }
  0x3e   :  { %v2425_v30 = vpack.c.bf16 %v105_v28, %v97_v27  ;;  %v104_v33 = vld [vmem:[#allocation6 + $0x150] sm:$0xff]  ;;  %v2363_v34 = vpack.c.bf16 %v102_v31, %v94_v29  ;;  %v111_v35 = vld [vmem:[#allocation6 + $0x188] sm:$0xff]  ;;  %v113_v37 = vld [vmem:[#allocation6 + $0x198] sm:$0xff] }
  0x3f   :  { %2360 = vmatpush1.bf16.msra.mxu0 %v2359_v21  ;;  %v119_v36 = vld [vmem:[#allocation6 + $0x1c8] sm:$0xff]  ;;  %v2427_v38 = vpack.c.bf16 %v104_v33, %v96_v32  ;;  %v121_v40 = vld [vmem:[#allocation6 + $0x1d8] sm:$0xff]  ;;  %v110_v41 = vld [vmem:[#allocation6 + $0x180] sm:$0xff] }
  0x40   :  { %2424 = vmatpush1.bf16.msra.mxu1 %v2423_v25  ;;  %2362 = vmatprep.subr.bf16.mxu0 %v2361_v26  ;;  %v2365_v39 = vpack.c.bf16 %v119_v36, %v111_v35  ;;  %v118_v42 = vld [vmem:[#allocation6 + $0x1c0] sm:$0xff]  ;;  %v2429_v43 = vpack.c.bf16 %v121_v40, %v113_v37  ;;  %v112_v44 = vld [vmem:[#allocation6 + $0x190] sm:$0xff]  ;;  %v127_v46 = vld [vmem:[#allocation6 + $0x208] sm:$0xff] }
  0x41   :  { %2426 = vmatprep.subr.bf16.mxu1 %v2425_v30  ;;  %v120_v45 = vld [vmem:[#allocation6 + $0x1d0] sm:$0xff]  ;;  %v135_v47 = vld [vmem:[#allocation6 + $0x248] sm:$0xff]  ;;  %v129_v48 = vld [vmem:[#allocation6 + $0x218] sm:$0xff]  ;;  %v2367_v50 = vpack.c.bf16 %v118_v42, %v110_v41 }
  0x42   :  { %v137_v49 = vld [vmem:[#allocation6 + $0x258] sm:$0xff]  ;;  %v2431_v51 = vpack.c.bf16 %v120_v45, %v112_v44  ;;  %v2369_v52 = vpack.c.bf16 %v135_v47, %v127_v46  ;;  %v126_v53 = vld [vmem:[#allocation6 + $0x200] sm:$0xff]  ;;  %v128_v55 = vld [vmem:[#allocation6 + $0x210] sm:$0xff] }
  0x43   :  { %2364 = vmatpush1.bf16.msra.mxu0 %v2363_v34  ;;  %v134_v54 = vld [vmem:[#allocation6 + $0x240] sm:$0xff]  ;;  %v2433_v56 = vpack.c.bf16 %v137_v49, %v129_v48  ;;  %v136_v57 = vld [vmem:[#allocation6 + $0x250] sm:$0xff]  ;;  %v143_v58 = vld [vmem:[#allocation6 + $0x288] sm:$0xff] }
  0x44   :  { %2428 = vmatpush1.bf16.msra.mxu1 %v2427_v38  ;;  %2366 = vmatprep.subr.bf16.mxu0 %v2365_v39  ;;  %v151_v59 = vld [vmem:[#allocation6 + $0x2c8] sm:$0xff]  ;;  %v145_v60 = vld [vmem:[#allocation6 + $0x298] sm:$0xff]  ;;  %v2371_v62 = vpack.c.bf16 %v134_v54, %v126_v53  ;;  %v2435_v63 = vpack.c.bf16 %v136_v57, %v128_v55  ;;  %v142_v1 = vld [vmem:[#allocation6 + $0x280] sm:$0xff] }
  0x45   :  { %2430 = vmatprep.subr.bf16.mxu1 %v2429_v43  ;;  %v153_v61 = vld [vmem:[#allocation6 + $0x2d8] sm:$0xff]  ;;  %v2373_v0 = vpack.c.bf16 %v151_v59, %v143_v58  ;;  %v150_v2 = vld [vmem:[#allocation6 + $0x2c0] sm:$0xff]  ;;  %v144_v3 = vld [vmem:[#allocation6 + $0x290] sm:$0xff] }
  0x46   :  { %v2437_v4 = vpack.c.bf16 %v153_v61, %v145_v60  ;;  %v152_v5 = vld [vmem:[#allocation6 + $0x2d0] sm:$0xff]  ;;  %v159_v6 = vld [vmem:[#allocation6 + $0x308] sm:$0xff]  ;;  %v161_v8 = vld [vmem:[#allocation6 + $0x318] sm:$0xff]  ;;  %v2375_v10 = vpack.c.bf16 %v150_v2, %v142_v1 }
  0x47   :  { %2368 = vmatpush1.bf16.msra.mxu0 %v2367_v50  ;;  %v167_v7 = vld [vmem:[#allocation6 + $0x348] sm:$0xff]  ;;  %v169_v9 = vld [vmem:[#allocation6 + $0x358] sm:$0xff]  ;;  %v2439_v11 = vpack.c.bf16 %v152_v5, %v144_v3  ;;  %v158_v13 = vld [vmem:[#allocation6 + $0x300] sm:$0xff] }
  0x48   :  { %2432 = vmatpush1.bf16.msra.mxu1 %v2431_v51  ;;  %2370 = vmatprep.subr.bf16.mxu0 %v2369_v52  ;;  %v2377_v12 = vpack.c.bf16 %v167_v7, %v159_v6  ;;  %v166_v14 = vld [vmem:[#allocation6 + $0x340] sm:$0xff]  ;;  %v160_v15 = vld [vmem:[#allocation6 + $0x310] sm:$0xff]  ;;  %v2441_v16 = vpack.c.bf16 %v169_v9, %v161_v8  ;;  %v175_v18 = vld [vmem:[#allocation6 + $0x388] sm:$0xff] }
  0x49   :  { %2434 = vmatprep.subr.bf16.mxu1 %v2433_v56  ;;  %v168_v17 = vld [vmem:[#allocation6 + $0x350] sm:$0xff]  ;;  %v183_v19 = vld [vmem:[#allocation6 + $0x3c8] sm:$0xff]  ;;  %v177_v20 = vld [vmem:[#allocation6 + $0x398] sm:$0xff]  ;;  %v2379_v22 = vpack.c.bf16 %v166_v14, %v158_v13 }
  0x4a   :  { %v185_v21 = vld [vmem:[#allocation6 + $0x3d8] sm:$0xff]  ;;  %v2443_v23 = vpack.c.bf16 %v168_v17, %v160_v15  ;;  %v2381_v24 = vpack.c.bf16 %v183_v19, %v175_v18  ;;  %v174_v25 = vld [vmem:[#allocation6 + $0x380] sm:$0xff]  ;;  %v176_v27 = vld [vmem:[#allocation6 + $0x390] sm:$0xff] }
  0x4b   :  { %2372 = vmatpush1.bf16.msra.mxu0 %v2371_v62  ;;  %v182_v26 = vld [vmem:[#allocation6 + $0x3c0] sm:$0xff]  ;;  %v2445_v28 = vpack.c.bf16 %v185_v21, %v177_v20  ;;  %v184_v29 = vld [vmem:[#allocation6 + $0x3d0] sm:$0xff]  ;;  %v191_v30 = vld [vmem:[#allocation6 + $0x408] sm:$0xff] }
  0x4c   :  { %2436 = vmatpush1.bf16.msra.mxu1 %v2435_v63  ;;  %2374 = vmatprep.subr.bf16.mxu0 %v2373_v0  ;;  %v199_v31 = vld [vmem:[#allocation6 + $0x448] sm:$0xff]  ;;  %v193_v32 = vld [vmem:[#allocation6 + $0x418] sm:$0xff]  ;;  %v2383_v34 = vpack.c.bf16 %v182_v26, %v174_v25  ;;  %v2447_v35 = vpack.c.bf16 %v184_v29, %v176_v27  ;;  %v190_v37 = vld [vmem:[#allocation6 + $0x400] sm:$0xff] }
  0x4d   :  { %2438 = vmatprep.subr.bf16.mxu1 %v2437_v4  ;;  %v201_v33 = vld [vmem:[#allocation6 + $0x458] sm:$0xff]  ;;  %v2385_v36 = vpack.c.bf16 %v199_v31, %v191_v30  ;;  %v198_v38 = vld [vmem:[#allocation6 + $0x440] sm:$0xff]  ;;  %v192_v39 = vld [vmem:[#allocation6 + $0x410] sm:$0xff] }
  0x4e   :  { %v2449_v40 = vpack.c.bf16 %v201_v33, %v193_v32  ;;  %v200_v41 = vld [vmem:[#allocation6 + $0x450] sm:$0xff]  ;;  %v207_v42 = vld [vmem:[#allocation6 + $0x488] sm:$0xff]  ;;  %v209_v44 = vld [vmem:[#allocation6 + $0x498] sm:$0xff]  ;;  %v2387_v46 = vpack.c.bf16 %v198_v38, %v190_v37 }
  0x4f   :  { %2376 = vmatpush1.bf16.msra.mxu0 %v2375_v10  ;;  %v215_v43 = vld [vmem:[#allocation6 + $0x4c8] sm:$0xff]  ;;  %v217_v45 = vld [vmem:[#allocation6 + $0x4d8] sm:$0xff]  ;;  %v2451_v47 = vpack.c.bf16 %v200_v41, %v192_v39  ;;  %v206_v49 = vld [vmem:[#allocation6 + $0x480] sm:$0xff] }
  0x50   :  { %2440 = vmatpush1.bf16.msra.mxu1 %v2439_v11  ;;  %2378 = vmatprep.subr.bf16.mxu0 %v2377_v12  ;;  %v2389_v48 = vpack.c.bf16 %v215_v43, %v207_v42  ;;  %v214_v50 = vld [vmem:[#allocation6 + $0x4c0] sm:$0xff]  ;;  %v208_v51 = vld [vmem:[#allocation6 + $0x490] sm:$0xff]  ;;  %v2453_v52 = vpack.c.bf16 %v217_v45, %v209_v44  ;;  %v223_v54 = vld [vmem:[#allocation6 + $0x508] sm:$0xff] }
  0x51   :  { %2442 = vmatprep.subr.bf16.mxu1 %v2441_v16  ;;  %v216_v53 = vld [vmem:[#allocation6 + $0x4d0] sm:$0xff]  ;;  %v231_v55 = vld [vmem:[#allocation6 + $0x548] sm:$0xff]  ;;  %v225_v56 = vld [vmem:[#allocation6 + $0x518] sm:$0xff]  ;;  %v2391_v58 = vpack.c.bf16 %v214_v50, %v206_v49 }
  0x52   :  { %v233_v57 = vld [vmem:[#allocation6 + $0x558] sm:$0xff]  ;;  %v2455_v59 = vpack.c.bf16 %v216_v53, %v208_v51  ;;  %v2393_v60 = vpack.c.bf16 %v231_v55, %v223_v54  ;;  %v222_v61 = vld [vmem:[#allocation6 + $0x500] sm:$0xff]  ;;  %v224_v63 = vld [vmem:[#allocation6 + $0x510] sm:$0xff] }
  0x53   :  { %2380 = vmatpush1.bf16.msra.mxu0 %v2379_v22  ;;  %v230_v62 = vld [vmem:[#allocation6 + $0x540] sm:$0xff]  ;;  %v2457_v0 = vpack.c.bf16 %v233_v57, %v225_v56  ;;  %v232_v1 = vld [vmem:[#allocation6 + $0x550] sm:$0xff]  ;;  %v239_v2 = vld [vmem:[#allocation6 + $0x588] sm:$0xff] }
  0x54   :  { %2444 = vmatpush1.bf16.msra.mxu1 %v2443_v23  ;;  %2382 = vmatprep.subr.bf16.mxu0 %v2381_v24  ;;  %v247_v3 = vld [vmem:[#allocation6 + $0x5c8] sm:$0xff]  ;;  %v241_v4 = vld [vmem:[#allocation6 + $0x598] sm:$0xff]  ;;  %v2395_v6 = vpack.c.bf16 %v230_v62, %v222_v61  ;;  %v238_v7 = vld [vmem:[#allocation6 + $0x580] sm:$0xff]  ;;  %v2459_v8 = vpack.c.bf16 %v232_v1, %v224_v63 }
  0x55   :  { %2446 = vmatprep.subr.bf16.mxu1 %v2445_v28  ;;  %v249_v5 = vld [vmem:[#allocation6 + $0x5d8] sm:$0xff]  ;;  %v2397_v9 = vpack.c.bf16 %v247_v3, %v239_v2  ;;  %v246_v10 = vld [vmem:[#allocation6 + $0x5c0] sm:$0xff]  ;;  %v240_v11 = vld [vmem:[#allocation6 + $0x590] sm:$0xff] }
  0x56   :  { %v248_v12 = vld [vmem:[#allocation6 + $0x5d0] sm:$0xff]  ;;  %v2461_v13 = vpack.c.bf16 %v249_v5, %v241_v4  ;;  %v255_v14 = vld [vmem:[#allocation6 + $0x608] sm:$0xff]  ;;  %v2872_v16 = vld [vmem:[#allocation3 + $0x8] sm:$0xff]  ;;  %v2399_v19 = vpack.c.bf16 %v246_v10, %v238_v7 }
  0x57   :  { %2384 = vmatpush1.bf16.msra.mxu0 %v2383_v34  ;;  %v263_v15 = vld [vmem:[#allocation6 + $0x648] sm:$0xff]  ;;  %v257_v17 = vld [vmem:[#allocation6 + $0x618] sm:$0xff]  ;;  %382 = vmatprep.mubr.f32.mxu0 %v2872_v16  ;;  %v2463_v20 = vpack.c.bf16 %v248_v12, %v240_v11  ;;  %v254_v22 = vld [vmem:[#allocation6 + $0x600] sm:$0xff] }
  0x58   :  { %2448 = vmatpush1.bf16.msra.mxu1 %v2447_v35  ;;  %2386 = vmatprep.subr.bf16.mxu0 %v2385_v36  ;;  %v265_v18 = vld [vmem:[#allocation6 + $0x658] sm:$0xff]  ;;  %v2401_v21 = vpack.c.bf16 %v263_v15, %v255_v14  ;;  %v262_v23 = vld [vmem:[#allocation6 + $0x640] sm:$0xff]  ;;  %v256_v24 = vld [vmem:[#allocation6 + $0x610] sm:$0xff] }
  0x59   :  { %2450 = vmatprep.subr.bf16.mxu1 %v2449_v40  ;;  %453 = vmatprep.mubr.f32.mxu1 %v2872_v16  ;;  %v2465_v25 = vpack.c.bf16 %v265_v18, %v257_v17  ;;  %v264_v26 = vld [vmem:[#allocation6 + $0x650] sm:$0xff]  ;;  %v271_v27 = vld [vmem:[#allocation6 + $0x688] sm:$0xff]  ;;  %v273_v29 = vld [vmem:[#allocation6 + $0x698] sm:$0xff]  ;;  %v2403_v31 = vpack.c.bf16 %v262_v23, %v254_v22 }
  0x5a   :  { %v279_v28 = vld [vmem:[#allocation6 + $0x6c8] sm:$0xff]  ;;  %v281_v30 = vld [vmem:[#allocation6 + $0x6d8] sm:$0xff]  ;;  %v2467_v32 = vpack.c.bf16 %v264_v26, %v256_v24  ;;  %v270_v34 = vld [vmem:[#allocation6 + $0x680] sm:$0xff] }
  0x5b   :  { %2388 = vmatpush1.bf16.msra.mxu0 %v2387_v46  ;;  %v2405_v33 = vpack.c.bf16 %v279_v28, %v271_v27  ;;  %v278_v35 = vld [vmem:[#allocation6 + $0x6c0] sm:$0xff]  ;;  %v272_v36 = vld [vmem:[#allocation6 + $0x690] sm:$0xff]  ;;  %v2469_v37 = vpack.c.bf16 %v281_v30, %v273_v29  ;;  %v287_v39 = vld [vmem:[#allocation6 + $0x708] sm:$0xff] }
  0x5c   :  { %2452 = vmatpush1.bf16.msra.mxu1 %v2451_v47  ;;  %2390 = vmatprep.subr.bf16.mxu0 %v2389_v48  ;;  %v280_v38 = vld [vmem:[#allocation6 + $0x6d0] sm:$0xff]  ;;  %v295_v40 = vld [vmem:[#allocation6 + $0x748] sm:$0xff]  ;;  %v289_v41 = vld [vmem:[#allocation6 + $0x718] sm:$0xff]  ;;  %v2407_v43 = vpack.c.bf16 %v278_v35, %v270_v34 }
  0x5d   :  { %2454 = vmatprep.subr.bf16.mxu1 %v2453_v52  ;;  %v297_v42 = vld [vmem:[#allocation6 + $0x758] sm:$0xff]  ;;  %v2471_v44 = vpack.c.bf16 %v280_v38, %v272_v36  ;;  %v2409_v45 = vpack.c.bf16 %v295_v40, %v287_v39  ;;  %v286_v46 = vld [vmem:[#allocation6 + $0x700] sm:$0xff]  ;;  %v288_v48 = vld [vmem:[#allocation6 + $0x710] sm:$0xff] }
  0x5e   :  { %v294_v47 = vld [vmem:[#allocation6 + $0x740] sm:$0xff]  ;;  %v2473_v49 = vpack.c.bf16 %v297_v42, %v289_v41  ;;  %v296_v50 = vld [vmem:[#allocation6 + $0x750] sm:$0xff]  ;;  %v303_v51 = vld [vmem:[#allocation6 + $0x788] sm:$0xff] }
  0x5f   :  { %2392 = vmatpush1.bf16.msra.mxu0 %v2391_v58  ;;  %v311_v52 = vld [vmem:[#allocation6 + $0x7c8] sm:$0xff]  ;;  %v305_v53 = vld [vmem:[#allocation6 + $0x798] sm:$0xff]  ;;  %v2411_v55 = vpack.c.bf16 %v294_v47, %v286_v46  ;;  %v2475_v56 = vpack.c.bf16 %v296_v50, %v288_v48  ;;  %v302_v58 = vld [vmem:[#allocation6 + $0x780] sm:$0xff] }
  0x60   :  { %2456 = vmatpush1.bf16.msra.mxu1 %v2455_v59  ;;  %2394 = vmatprep.subr.bf16.mxu0 %v2393_v60  ;;  %v313_v54 = vld [vmem:[#allocation6 + $0x7d8] sm:$0xff]  ;;  %v2413_v57 = vpack.c.bf16 %v311_v52, %v303_v51  ;;  %v310_v59 = vld [vmem:[#allocation6 + $0x7c0] sm:$0xff]  ;;  %v304_v60 = vld [vmem:[#allocation6 + $0x790] sm:$0xff] }
  0x61   :  { %2458 = vmatprep.subr.bf16.mxu1 %v2457_v0  ;;  %v2477_v61 = vpack.c.bf16 %v313_v54, %v305_v53  ;;  %v312_v62 = vld [vmem:[#allocation6 + $0x7d0] sm:$0xff]  ;;  %v67_v63 = vld [vmem:[#allocation6 + $0x28] sm:$0xff]  ;;  %v69_v1 = vld [vmem:[#allocation6 + $0x38] sm:$0xff]  ;;  %v2415_v3 = vpack.c.bf16 %v310_v59, %v302_v58 }
  0x62   :  { %v75_v0 = vld [vmem:[#allocation6 + $0x68] sm:$0xff]  ;;  %v77_v2 = vld [vmem:[#allocation6 + $0x78] sm:$0xff]  ;;  %v2479_v4 = vpack.c.bf16 %v312_v62, %v304_v60  ;;  %v74_v7 = vld [vmem:[#allocation6 + $0x60] sm:$0xff] }
  0x63   :  { %2396 = vmatpush1.bf16.msra.mxu0 %v2395_v6  ;;  %v2481_v5 = vpack.c.bf16 %v75_v0, %v67_v63  ;;  %v66_v6 = vld [vmem:[#allocation6 + $0x20] sm:$0xff]  ;;  %v2545_v10 = vpack.c.bf16 %v77_v2, %v69_v1  ;;  %v68_v11 = vld [vmem:[#allocation6 + $0x30] sm:$0xff]  ;;  %v93_v14 = vld [vmem:[#allocation6 + $0xf8] sm:$0xff] }
  0x64   :  { %2460 = vmatpush1.bf16.msra.mxu1 %v2459_v8  ;;  %2398 = vmatprep.subr.bf16.mxu0 %v2397_v9  ;;  %v83_v8 = vld [vmem:[#allocation6 + $0xa8] sm:$0xff]  ;;  %v76_v12 = vld [vmem:[#allocation6 + $0x70] sm:$0xff]  ;;  %v2483_v17 = vpack.c.bf16 %v74_v7, %v66_v6  ;;  %v101_v27 = vld [vmem:[#allocation6 + $0x138] sm:$0xff] }
  0x65   :  { %2462 = vmatprep.subr.bf16.mxu1 %v2461_v13  ;;  %v91_v9 = vld [vmem:[#allocation6 + $0xe8] sm:$0xff]  ;;  %v85_v13 = vld [vmem:[#allocation6 + $0xb8] sm:$0xff]  ;;  %v2876_v15 = vld [vmem:[#allocation3] sm:$0xff]  ;;  %v2547_v22 = vpack.c.bf16 %v76_v12, %v68_v11 }
  0x66   :  { %v2485_v18 = vpack.c.bf16 %v91_v9, %v83_v8  ;;  %v107_v23 = vld [vmem:[#allocation6 + $0x168] sm:$0xff]  ;;  %v2549_v24 = vpack.c.bf16 %v93_v14, %v85_v13  ;;  %v92_v26 = vld [vmem:[#allocation6 + $0xf0] sm:$0xff]  ;;  %v109_v28 = vld [vmem:[#allocation6 + $0x178] sm:$0xff] }
  0x67   :  { %2400 = vmatpush1.bf16.msra.mxu0 %v2399_v19  ;;  %v82_v19 = vld [vmem:[#allocation6 + $0xa0] sm:$0xff]  ;;  %v123_v35 = vld [vmem:[#allocation6 + $0x1e8] sm:$0xff]  ;;  %v2553_v36 = vpack.c.bf16 %v109_v28, %v101_v27  ;;  %v108_v38 = vld [vmem:[#allocation6 + $0x170] sm:$0xff] }
  0x68   :  { %2464 = vmatpush1.bf16.msra.mxu1 %v2463_v20  ;;  %2402 = vmatprep.subr.bf16.mxu0 %v2401_v21  ;;  %v90_v20 = vld [vmem:[#allocation6 + $0xe0] sm:$0xff]  ;;  %v99_v21 = vld [vmem:[#allocation6 + $0x128] sm:$0xff]  ;;  %v117_v39 = vld [vmem:[#allocation6 + $0x1b8] sm:$0xff] }
  0x69   :  { %2466 = vmatprep.subr.bf16.mxu1 %v2465_v25  ;;  %v84_v25 = vld [vmem:[#allocation6 + $0xb0] sm:$0xff]  ;;  %v2487_v29 = vpack.c.bf16 %v90_v20, %v82_v19  ;;  %v2489_v30 = vpack.c.bf16 %v107_v23, %v99_v21  ;;  %v125_v40 = vld [vmem:[#allocation6 + $0x1f8] sm:$0xff]  ;;  %v139_v47 = vld [vmem:[#allocation6 + $0x268] sm:$0xff] }
  0x6a   :  { %v2551_v34 = vpack.c.bf16 %v92_v26, %v84_v25  ;;  %v2557_v48 = vpack.c.bf16 %v125_v40, %v117_v39  ;;  %v124_v50 = vld [vmem:[#allocation6 + $0x1f0] sm:$0xff]  ;;  %v133_v51 = vld [vmem:[#allocation6 + $0x238] sm:$0xff]  ;;  %v130_v54 = vld [vmem:[#allocation6 + $0x220] sm:$0xff] }
  0x6b   :  { %2404 = vmatpush1.bf16.msra.mxu0 %v2403_v31  ;;  %v98_v31 = vld [vmem:[#allocation6 + $0x120] sm:$0xff]  ;;  %v141_v52 = vld [vmem:[#allocation6 + $0x278] sm:$0xff]  ;;  %v155_v58 = vld [vmem:[#allocation6 + $0x2e8] sm:$0xff] }
  0x6c   :  { %2468 = vmatpush1.bf16.msra.mxu1 %v2467_v32  ;;  %2406 = vmatprep.subr.bf16.mxu0 %v2405_v33  ;;  %v106_v32 = vld [vmem:[#allocation6 + $0x160] sm:$0xff]  ;;  %v115_v33 = vld [vmem:[#allocation6 + $0x1a8] sm:$0xff]  ;;  %v2561_v59 = vpack.c.bf16 %v141_v52, %v133_v51  ;;  %v132_v60 = vld [vmem:[#allocation6 + $0x230] sm:$0xff] }
  0x6d   :  { %2470 = vmatprep.subr.bf16.mxu1 %v2469_v37  ;;  %v100_v37 = vld [vmem:[#allocation6 + $0x130] sm:$0xff]  ;;  %v2491_v41 = vpack.c.bf16 %v106_v32, %v98_v31  ;;  %v2493_v42 = vpack.c.bf16 %v123_v35, %v115_v33  ;;  %v149_v62 = vld [vmem:[#allocation6 + $0x2b8] sm:$0xff]  ;;  %v146_v2 = vld [vmem:[#allocation6 + $0x2a0] sm:$0xff] }
  0x6e   :  { %v2555_v46 = vpack.c.bf16 %v108_v38, %v100_v37  ;;  %v157_v63 = vld [vmem:[#allocation6 + $0x2f8] sm:$0xff]  ;;  %v171_v6 = vld [vmem:[#allocation6 + $0x368] sm:$0xff]  ;;  %v148_v8 = vld [vmem:[#allocation6 + $0x2b0] sm:$0xff] }
  0x6f   :  { %2408 = vmatpush1.bf16.msra.mxu0 %v2407_v43  ;;  %v114_v43 = vld [vmem:[#allocation6 + $0x1a0] sm:$0xff]  ;;  %v2565_v7 = vpack.c.bf16 %v157_v63, %v149_v62  ;;  %v156_v9 = vld [vmem:[#allocation6 + $0x2f0] sm:$0xff]  ;;  %v173_v11 = vld [vmem:[#allocation6 + $0x378] sm:$0xff] }
  0x70   :  { %2472 = vmatpush1.bf16.msra.mxu1 %v2471_v44  ;;  %2410 = vmatprep.subr.bf16.mxu0 %v2409_v45  ;;  %v122_v44 = vld [vmem:[#allocation6 + $0x1e0] sm:$0xff]  ;;  %v131_v45 = vld [vmem:[#allocation6 + $0x228] sm:$0xff]  ;;  %v2567_v19 = vpack.c.bf16 %v156_v9, %v148_v8  ;;  %v172_v23 = vld [vmem:[#allocation6 + $0x370] sm:$0xff] }
  0x71   :  { %2474 = vmatprep.subr.bf16.mxu1 %v2473_v49  ;;  %v116_v49 = vld [vmem:[#allocation6 + $0x1b0] sm:$0xff]  ;;  %v2495_v53 = vpack.c.bf16 %v122_v44, %v114_v43  ;;  %v162_v14 = vld [vmem:[#allocation6 + $0x320] sm:$0xff]  ;;  %v187_v20 = vld [vmem:[#allocation6 + $0x3e8] sm:$0xff] }
  0x72   :  { %v189_v25 = vld [vmem:[#allocation6 + $0x3f8] sm:$0xff]  ;;  %v178_v28 = vld [vmem:[#allocation6 + $0x3a0] sm:$0xff]  ;;  %v203_v32 = vld [vmem:[#allocation6 + $0x468] sm:$0xff] }
  0x73   :  { %2412 = vmatpush1.bf16.msra.mxu0 %v2411_v55  ;;  %v138_v55 = vld [vmem:[#allocation6 + $0x260] sm:$0xff]  ;;  %v188_v35 = vld [vmem:[#allocation6 + $0x3f0] sm:$0xff]  ;;  %v205_v37 = vld [vmem:[#allocation6 + $0x478] sm:$0xff] }
  0x74   :  { %2476 = vmatpush1.bf16.msra.mxu1 %v2475_v56  ;;  %2414 = vmatprep.subr.bf16.mxu0 %v2413_v57  ;;  %v147_v56 = vld [vmem:[#allocation6 + $0x2a8] sm:$0xff]  ;;  %v2559_v57 = vpack.c.bf16 %v124_v50, %v116_v49  ;;  %v2499_v0 = vpack.c.bf16 %v138_v55, %v130_v54  ;;  %v194_v40 = vld [vmem:[#allocation6 + $0x420] sm:$0xff]  ;;  %v221_v49 = vld [vmem:[#allocation6 + $0x4f8] sm:$0xff] }
  0x75   :  { %2478 = vmatprep.subr.bf16.mxu1 %v2477_v61  ;;  %v140_v61 = vld [vmem:[#allocation6 + $0x270] sm:$0xff]  ;;  %v2501_v1 = vpack.c.bf16 %v155_v58, %v147_v56  ;;  %v219_v44 = vld [vmem:[#allocation6 + $0x4e8] sm:$0xff]  ;;  %v210_v52 = vld [vmem:[#allocation6 + $0x4a0] sm:$0xff] }
  0x76   :  { %v235_v55 = vld [vmem:[#allocation6 + $0x568] sm:$0xff]  ;;  %v220_v58 = vld [vmem:[#allocation6 + $0x4f0] sm:$0xff]  ;;  %v226_v63 = vld [vmem:[#allocation6 + $0x520] sm:$0xff] }
  0x77   :  { %2416 = vmatpush1.bf16.msra.mxu0 %v2415_v3  ;;  %v154_v3 = vld [vmem:[#allocation6 + $0x2e0] sm:$0xff]  ;;  %v253_v8 = vld [vmem:[#allocation6 + $0x5f8] sm:$0xff] }
  0x78   :  { %2480 = vmatpush1.bf16.msra.mxu1 %v2479_v4  ;;  %2482 = vmatprep.subr.bf16.mxu0 %v2481_v5  ;;  %v163_v4 = vld [vmem:[#allocation6 + $0x328] sm:$0xff]  ;;  %v2563_v5 = vpack.c.bf16 %v140_v61, %v132_v60  ;;  %v2503_v12 = vpack.c.bf16 %v154_v3, %v146_v2  ;;  %v237_v60 = vld [vmem:[#allocation6 + $0x578] sm:$0xff] }
  0x79   :  { %2546 = vmatprep.subr.bf16.mxu1 %v2545_v10  ;;  %v165_v10 = vld [vmem:[#allocation6 + $0x338] sm:$0xff]  ;;  %v2505_v13 = vpack.c.bf16 %v171_v6, %v163_v4  ;;  %v251_v3 = vld [vmem:[#allocation6 + $0x5e8] sm:$0xff]  ;;  %v236_v6 = vld [vmem:[#allocation6 + $0x570] sm:$0xff] }
  0x7a   :  { %383 = vmatmul.mubr.f32.vlgmr.msra.gmra.mrb[0].mxu0 %v2876_v15  ;;  %v2569_v21 = vpack.c.bf16 %v173_v11, %v165_v10  ;;  %v242_v11 = vld [vmem:[#allocation6 + $0x5a0] sm:$0xff] }
  0x7b   :  { %454 = vmatmul.mubr.f32.vlgmr.msra.gmra.mrb[0].mxu1 %v2876_v15  ;;  %2484 = vmatpush1.bf16.msra.mxu0 %v2483_v17  ;;  %v170_v17 = vld [vmem:[#allocation6 + $0x360] sm:$0xff] }
  0x7c   :  { %2486 = vmatprep.subr.bf16.mxu0 %v2485_v18  ;;  %2548 = vmatpush1.bf16.msra.mxu1 %v2547_v22  ;;  %v179_v18 = vld [vmem:[#allocation6 + $0x3a8] sm:$0xff]  ;;  %v164_v22 = vld [vmem:[#allocation6 + $0x330] sm:$0xff]  ;;  %v2507_v26 = vpack.c.bf16 %v170_v17, %v162_v14 }
  0x7d   :  { %2550 = vmatprep.subr.bf16.mxu1 %v2549_v24  ;;  %524 = vmatprep.mubr.f32.mxu0 %v2872_v16  ;;  %v181_v24 = vld [vmem:[#allocation6 + $0x3b8] sm:$0xff]  ;;  %v2509_v27 = vpack.c.bf16 %v187_v20, %v179_v18  ;;  %v2571_v31 = vpack.c.bf16 %v172_v23, %v164_v22  ;;  %v267_v17 = vld [vmem:[#allocation6 + $0x668] sm:$0xff]  ;;  %v252_v20 = vld [vmem:[#allocation6 + $0x5f0] sm:$0xff] }
  0x7e   :  { %595 = vmatprep.mubr.f32.mxu1 %v2872_v16  ;;  %v2497_v16 = vpack.c.bf16 %v139_v47, %v131_v45  ;;  %v2573_v33 = vpack.c.bf16 %v189_v25, %v181_v24  ;;  %v204_v47 = vld [vmem:[#allocation6 + $0x470] sm:$0xff]  ;;  %v269_v22 = vld [vmem:[#allocation6 + $0x678] sm:$0xff]  ;;  %v258_v25 = vld [vmem:[#allocation6 + $0x620] sm:$0xff] }
  0x7f   :  { %2488 = vmatpush1.bf16.msra.mxu0 %v2487_v29  ;;  %v186_v29 = vld [vmem:[#allocation6 + $0x3e0] sm:$0xff] }
  0x80   :  { %2490 = vmatprep.subr.bf16.mxu0 %v2489_v30  ;;  %2552 = vmatpush1.bf16.msra.mxu1 %v2551_v34  ;;  %v195_v30 = vld [vmem:[#allocation6 + $0x428] sm:$0xff]  ;;  %v180_v34 = vld [vmem:[#allocation6 + $0x3b0] sm:$0xff]  ;;  %v2511_v38 = vpack.c.bf16 %v186_v29, %v178_v28 }
  0x81   :  { %2554 = vmatprep.subr.bf16.mxu1 %v2553_v36  ;;  %v197_v36 = vld [vmem:[#allocation6 + $0x438] sm:$0xff]  ;;  %v2513_v39 = vpack.c.bf16 %v203_v32, %v195_v30  ;;  %v2575_v43 = vpack.c.bf16 %v188_v35, %v180_v34  ;;  %v283_v29 = vld [vmem:[#allocation6 + $0x6e8] sm:$0xff]  ;;  %v268_v32 = vld [vmem:[#allocation6 + $0x670] sm:$0xff] }
  0x82   :  { %v2577_v45 = vpack.c.bf16 %v205_v37, %v197_v36  ;;  %v285_v34 = vld [vmem:[#allocation6 + $0x6f8] sm:$0xff]  ;;  %v274_v37 = vld [vmem:[#allocation6 + $0x6a0] sm:$0xff] }
  0x83   :  { %2492 = vmatpush1.bf16.msra.mxu0 %v2491_v41  ;;  %v202_v41 = vld [vmem:[#allocation6 + $0x460] sm:$0xff] }
  0x84   :  { %2494 = vmatprep.subr.bf16.mxu0 %v2493_v42  ;;  %2556 = vmatpush1.bf16.msra.mxu1 %v2555_v46  ;;  %v211_v42 = vld [vmem:[#allocation6 + $0x4a8] sm:$0xff]  ;;  %v196_v46 = vld [vmem:[#allocation6 + $0x430] sm:$0xff]  ;;  %v2515_v50 = vpack.c.bf16 %v202_v41, %v194_v40 }
  0x85   :  { %2558 = vmatprep.subr.bf16.mxu1 %v2557_v48  ;;  %v213_v48 = vld [vmem:[#allocation6 + $0x4b8] sm:$0xff]  ;;  %v2517_v51 = vpack.c.bf16 %v219_v44, %v211_v42  ;;  %v2579_v54 = vpack.c.bf16 %v204_v47, %v196_v46  ;;  %v299_v41 = vld [vmem:[#allocation6 + $0x768] sm:$0xff]  ;;  %v284_v44 = vld [vmem:[#allocation6 + $0x6f0] sm:$0xff] }
  0x86   :  { %v2581_v56 = vpack.c.bf16 %v221_v49, %v213_v48  ;;  %v301_v46 = vld [vmem:[#allocation6 + $0x778] sm:$0xff]  ;;  %v290_v49 = vld [vmem:[#allocation6 + $0x720] sm:$0xff] }
  0x87   :  { %2496 = vmatpush1.bf16.msra.mxu0 %v2495_v53  ;;  %v218_v53 = vld [vmem:[#allocation6 + $0x4e0] sm:$0xff] }
  0x88   :  { %2498 = vmatprep.subr.bf16.mxu0 %v2497_v16  ;;  %2560 = vmatpush1.bf16.msra.mxu1 %v2559_v57  ;;  %v227_v16 = vld [vmem:[#allocation6 + $0x528] sm:$0xff]  ;;  %v212_v57 = vld [vmem:[#allocation6 + $0x4b0] sm:$0xff]  ;;  %v2519_v61 = vpack.c.bf16 %v218_v53, %v210_v52 }
  0x89   :  { %2562 = vmatprep.subr.bf16.mxu1 %v2561_v59  ;;  %v229_v59 = vld [vmem:[#allocation6 + $0x538] sm:$0xff]  ;;  %v2521_v62 = vpack.c.bf16 %v235_v55, %v227_v16  ;;  %v2583_v2 = vpack.c.bf16 %v220_v58, %v212_v57  ;;  %v315_v53 = vld [vmem:[#allocation6 + $0x7e8] sm:$0xff]  ;;  %v300_v55 = vld [vmem:[#allocation6 + $0x770] sm:$0xff] }
  0x8a   :  { %v2585_v4 = vpack.c.bf16 %v237_v60, %v229_v59  ;;  %v317_v57 = vld [vmem:[#allocation6 + $0x7f8] sm:$0xff]  ;;  %v306_v60 = vld [vmem:[#allocation6 + $0x7a0] sm:$0xff] }
  0x8b   :  { %2500 = vmatpush1.bf16.msra.mxu0 %v2499_v0  ;;  %v234_v0 = vld [vmem:[#allocation6 + $0x560] sm:$0xff] }
  0x8c   :  { %2502 = vmatprep.subr.bf16.mxu0 %v2501_v1  ;;  %2564 = vmatpush1.bf16.msra.mxu1 %v2563_v5  ;;  %v243_v1 = vld [vmem:[#allocation6 + $0x5a8] sm:$0xff]  ;;  %v228_v5 = vld [vmem:[#allocation6 + $0x530] sm:$0xff]  ;;  %v2523_v9 = vpack.c.bf16 %v234_v0, %v226_v63 }
  0x8d   :  { %2566 = vmatprep.subr.bf16.mxu1 %v2565_v7  ;;  %v245_v7 = vld [vmem:[#allocation6 + $0x5b8] sm:$0xff]  ;;  %v2525_v10 = vpack.c.bf16 %v251_v3, %v243_v1  ;;  %v2587_v14 = vpack.c.bf16 %v236_v6, %v228_v5  ;;  %v308_v0 = vld [vmem:[#allocation6 + $0x7b0] sm:$0xff] }
  0x8e   :  { %v2589_v18 = vpack.c.bf16 %v253_v8, %v245_v7  ;;  %v316_v1 = vld [vmem:[#allocation6 + $0x7f0] sm:$0xff] }
  0x8f   :  { %2504 = vmatpush1.bf16.msra.mxu0 %v2503_v12  ;;  %v250_v12 = vld [vmem:[#allocation6 + $0x5e0] sm:$0xff]  ;;  %v2607_v3 = vpack.c.bf16 %v316_v1, %v308_v0 }
  0x90   :  { %2506 = vmatprep.subr.bf16.mxu0 %v2505_v13  ;;  %2568 = vmatpush1.bf16.msra.mxu1 %v2567_v19  ;;  %v259_v13 = vld [vmem:[#allocation6 + $0x628] sm:$0xff]  ;;  %v244_v19 = vld [vmem:[#allocation6 + $0x5b0] sm:$0xff]  ;;  %v2527_v23 = vpack.c.bf16 %v250_v12, %v242_v11 }
  0x91   :  { %2570 = vmatprep.subr.bf16.mxu1 %v2569_v21  ;;  %v261_v21 = vld [vmem:[#allocation6 + $0x638] sm:$0xff]  ;;  %v2529_v24 = vpack.c.bf16 %v267_v17, %v259_v13  ;;  %v2591_v28 = vpack.c.bf16 %v252_v20, %v244_v19 }
  0x92   :  { %v2593_v30 = vpack.c.bf16 %v269_v22, %v261_v21  ;;  %v2797_v22 = vmov 0.0   ;;  %v1141_v0 = vld [vmem:[#allocation8 + $0x5] ss:$8 sm:$0xf] }
  0x93   :  { %2508 = vmatpush1.bf16.msra.mxu0 %v2507_v26  ;;  %v266_v26 = vld [vmem:[#allocation6 + $0x660] sm:$0xff] }
  0x94   :  { %2510 = vmatprep.subr.bf16.mxu0 %v2509_v27  ;;  %2572 = vmatpush1.bf16.msra.mxu1 %v2571_v31  ;;  %v275_v27 = vld [vmem:[#allocation6 + $0x6a8] sm:$0xff]  ;;  %v260_v31 = vld [vmem:[#allocation6 + $0x630] sm:$0xff]  ;;  %v2531_v35 = vpack.c.bf16 %v266_v26, %v258_v25 }
  0x95   :  { %2574 = vmatprep.subr.bf16.mxu1 %v2573_v33  ;;  %v277_v33 = vld [vmem:[#allocation6 + $0x6b8] sm:$0xff]  ;;  %v2533_v36 = vpack.c.bf16 %v283_v29, %v275_v27  ;;  %v2595_v40 = vpack.c.bf16 %v268_v32, %v260_v31 }
  0x96   :  { %v2597_v42 = vpack.c.bf16 %v285_v34, %v277_v33  ;;  %v747_v33 = vld [vmem:[#allocation8 + $0x1] ss:$8 sm:$0xf] }
  0x97   :  { %2512 = vmatpush1.bf16.msra.mxu0 %v2511_v38  ;;  %v282_v38 = vld [vmem:[#allocation6 + $0x6e0] sm:$0xff] }
  0x98   :  { %2514 = vmatprep.subr.bf16.mxu0 %v2513_v39  ;;  %2576 = vmatpush1.bf16.msra.mxu1 %v2575_v43  ;;  %v291_v39 = vld [vmem:[#allocation6 + $0x728] sm:$0xff]  ;;  %v276_v43 = vld [vmem:[#allocation6 + $0x6b0] sm:$0xff]  ;;  %v2535_v47 = vpack.c.bf16 %v282_v38, %v274_v37 }
  0x99   :  { %2578 = vmatprep.subr.bf16.mxu1 %v2577_v45  ;;  %v293_v45 = vld [vmem:[#allocation6 + $0x738] sm:$0xff]  ;;  %v2537_v48 = vpack.c.bf16 %v299_v41, %v291_v39  ;;  %v2599_v52 = vpack.c.bf16 %v284_v44, %v276_v43 }
  0x9a   :  { %v2601_v16 = vpack.c.bf16 %v301_v46, %v293_v45  ;;  %v748_v34 = vld [vmem:[#allocation8 + $0x1] ss:$8 sm:$0xf0]  ;;  %v984_v41 = vld [vmem:[#allocation8 + $0x3] ss:$8 sm:$0xf0] }
  0x9b   :  { %2516 = vmatpush1.bf16.msra.mxu0 %v2515_v50  ;;  %v298_v50 = vld [vmem:[#allocation6 + $0x760] sm:$0xff]  ;;  %v2975_v38 = vor.u32 %v748_v34, %v747_v33 }
  0x9c   :  { %2518 = vmatprep.subr.bf16.mxu0 %v2517_v51  ;;  %2580 = vmatpush1.bf16.msra.mxu1 %v2579_v54  ;;  %v307_v51 = vld [vmem:[#allocation6 + $0x7a8] sm:$0xff]  ;;  %v292_v54 = vld [vmem:[#allocation6 + $0x730] sm:$0xff]  ;;  %v2539_v58 = vpack.c.bf16 %v298_v50, %v290_v49 }
  0x9d   :  { %2582 = vmatprep.subr.bf16.mxu1 %v2581_v56  ;;  %v309_v56 = vld [vmem:[#allocation6 + $0x7b8] sm:$0xff]  ;;  %v2541_v59 = vpack.c.bf16 %v315_v53, %v307_v51 }
  0x9e   :  { %v2605_v63 = vpack.c.bf16 %v317_v57, %v309_v56 }
  0x9f   :  { %2520 = vmatpush1.bf16.msra.mxu0 %v2519_v61  ;;  %v314_v61 = vld [vmem:[#allocation6 + $0x7e0] sm:$0xff] }
  0xa0   :  { %2522 = vmatprep.subr.bf16.mxu0 %v2521_v62  ;;  %2584 = vmatpush1.bf16.msra.mxu1 %v2583_v2  ;;  %v2603_v62 = vpack.c.bf16 %v300_v55, %v292_v54  ;;  %v2543_v2 = vpack.c.bf16 %v314_v61, %v306_v60  ;;  %v630_v54 = vld [vmem:[#allocation8] ss:$8 sm:$0xf0] }
  0xa1   :  { %2586 = vmatprep.subr.bf16.mxu1 %v2585_v4 }
  0xa3   :  { %2524 = vmatpush1.bf16.msra.mxu0 %v2523_v9 }
  0xa4   :  { %2526 = vmatprep.subr.bf16.mxu0 %v2525_v10  ;;  %2588 = vmatpush1.bf16.msra.mxu1 %v2587_v14 }
  0xa5   :  { %2590 = vmatprep.subr.bf16.mxu1 %v2589_v18 }
  0xa7   :  { %2528 = vmatpush1.bf16.msra.mxu0 %v2527_v23 }
  0xa8   :  { %2530 = vmatprep.subr.bf16.mxu0 %v2529_v24  ;;  %2592 = vmatpush1.bf16.msra.mxu1 %v2591_v28  ;;  %v618_v28 = vlaneseq }
  0xa9   :  { %2594 = vmatprep.subr.bf16.mxu1 %v2593_v30 }
  0xaa   :  { %v2964_v31 = vshrl.u32 %v618_v28, 7 }
  0xab   :  { %2532 = vmatpush1.bf16.msra.mxu0 %v2531_v35 }
  0xac   :  { %2534 = vmatprep.subr.bf16.mxu0 %v2533_v36  ;;  %2596 = vmatpush1.bf16.msra.mxu1 %v2595_v40  ;;  %v2970_v36 = vand.u32 127, %v618_v28  ;;  %v2973_v37 = vsub.s32 3, %v2964_v31  ;;  %v983_v40 = vld [vmem:[#allocation8 + $0x3] ss:$8 sm:$0xf]  ;;  %v2985_v44 = vsub.s32 1, %v2964_v31 }
  0xad   :  { %2598 = vmatprep.subr.bf16.mxu1 %v2597_v42  ;;  %v2988_v45 = vsub.s32 2, %v2964_v31  ;;  %v2990_v46 = vor.u32 %v984_v41, %v983_v40 }
  0xae   :  { %vm737_vm0 = vcmp.lt.s32.totalorder %v2970_v36, 32  ;;  %v766_v43 = vrot.slane %v2975_v38, %v2973_v37  ;;  %vm973_vm1 = vcmp.lt.s32.totalorder %v2970_v36, 1  ;;  %vm620_vm2 = vcmp.lt.s32.totalorder %v2970_v36, 33 }
  0xaf   :  { %2536 = vmatpush1.bf16.msra.mxu0 %v2535_v47  ;;  %v994_v51 = vrot.slane %v2990_v46, %v2985_v44  ;;  %v1002_v61 = vrot.slane %v2990_v46, %v2973_v37  ;;  %v762_v28 = vrot.slane %v2975_v38, %v2988_v45  ;;  %vm1131_vm3 = vcmp.lt.s32.totalorder %v2970_v36, 127 }
  0xb0   :  { %2538 = vmatprep.subr.bf16.mxu0 %v2537_v48  ;;  %2600 = vmatpush1.bf16.msra.mxu1 %v2599_v52  ;;  %v998_v52 = vrot.slane %v2990_v46, %v2988_v45  ;;  %vm855_vm4 = vcmp.lt.s32.totalorder %v2970_v36, 31  ;;  %vm1367_vm5 = vcmp.lt.s32.totalorder %v2970_v36, 96  ;;  %vm1485_vm6 = vcmp.lt.s32.totalorder %v2970_v36, 95 }
  0xb1   :  { %2602 = vmatprep.subr.bf16.mxu1 %v2601_v16  ;;  %v629_v16 = vld [vmem:[#allocation8] ss:$8 sm:$0xf]  ;;  %vm1249_vm7 = vcmp.lt.s32.totalorder %v2970_v36, 97 }
  0xb3   :  { %2540 = vmatpush1.bf16.msra.mxu0 %v2539_v58 }
  0xb4   :  { %2542 = vmatprep.subr.bf16.mxu0 %v2541_v59  ;;  %2604 = vmatpush1.bf16.msra.mxu1 %v2603_v62  ;;  %v3014_v62 = vor.u32 %v630_v54, %v629_v16 }
  0xb5   :  { %2606 = vmatprep.subr.bf16.mxu1 %v2605_v63 }
  0xb6   :  { %v648_v40 = vrot.slane %v3014_v62, %v2973_v37 }
  0xb7   :  { %2544 = vmatpush1.bf16.msra.mxu0 %v2543_v2 }
  0xb8   :  { %2608 = vmatpush1.bf16.msra.mxu1 %v2607_v3 }
  0xba   :  { %525 = vmatmul.mubr.f32.vlgmr.msra.gmra.mrb[2].mxu0 %v2876_v15 }
  0xbb   :  { %596 = vmatmul.mubr.f32.vlgmr.msra.gmra.mrb[2].mxu1 %v2876_v15  ;;  %1791 = vmatprep.mubr.f32.mxu0 %v2797_v22 }
  0xbc   :  { %1862 = vmatprep.mubr.f32.mxu1 %v2797_v22 }
 0x14d   :  { %v384_v4 = vpop.f32.mrb[0].mxu0 }
 0x14e   :  { %1075 = vst [vmem:[#allocation2 + $0x100] sm:$0xf] %v384_v4  ;;  %v1091_v5 = vrot.slane %v384_v4, 4  ;;  %v455_v6 = vpop.f32.mrb[0].mxu1  ;;  %721 = vrot.lane.b32.xlu0 %v384_v4, %s2789_s2  ;;  %v386_v7 = vpop.f32.mrb[1].mxu0 }
 0x14f   :  { %1077 = vst [vmem:[#allocation2 + $0x110] sm:$0xf] %v455_v6  ;;  %v1093_v8 = vrot.slane %v455_v6, 4  ;;  %725 = vrot.lane.b32.xlu1 %v455_v6, %s2789_s2  ;;  %1076 = vst [vmem:[#allocation2 + $0x108] sm:$0xf] %v386_v7  ;;  %v1092_v9 = vrot.slane %v386_v7, 4 }
 0x150   :  { %v457_v10 = vpop.f32.mrb[1].mxu1  ;;  %1107 = vst [vmem:[#allocation2 + $0x140] sm:$0xf] %v1091_v5 }
 0x151   :  { %1078 = vst [vmem:[#allocation2 + $0x118] sm:$0xf] %v457_v10  ;;  %v1094_v11 = vrot.slane %v457_v10, 4  ;;  %1109 = vst [vmem:[#allocation2 + $0x150] sm:$0xf] %v1093_v8  ;;  %v644_v8 = vrot.slane %v3014_v62, %v2988_v45 }
 0x152   :  { %1108 = vst [vmem:[#allocation2 + $0x148] sm:$0xf] %v1092_v9  ;;  %957 = vrot.lane.b32.xlu0 %v384_v4, %s2790_s6  ;;  %v865_v9 = vld [vmem:[#allocation8 + $0x2] ss:$8 sm:$0xf] }
 0x153   :  { %1110 = vst [vmem:[#allocation2 + $0x158] sm:$0xf] %v1094_v11  ;;  %1119 = vrot.lane.b32.xlu1 %v455_v6, %s2791_s7 }
 0x156   :  { %961 = vrot.lane.b32.xlu0 %v455_v6, %s2790_s6 }
 0x157   :  { %1355 = vrot.lane.b32.xlu1 %v455_v6, %s2792_s8 }
 0x15a   :  { %602 = vrot.lane.b32.xlu0 %v384_v4, %s2793_s9 }
 0x15b   :  { %1351 = vrot.lane.b32.xlu1 %v384_v4, %s2792_s8 }
 0x15e   :  { %606 = vrot.lane.b32.xlu0 %v455_v6, %s2793_s9 }
 0x15f   :  { %1237 = vrot.lane.b32.xlu1 %v455_v6, %s2794_s10 }
 0x162   :  { %839 = vrot.lane.b32.xlu0 %v384_v4, %s2795_s11 }
 0x163   :  { %1469 = vrot.lane.b32.xlu1 %v384_v4, %s2796_s12 }
 0x166   :  { %843 = vrot.lane.b32.xlu0 %v455_v6, %s2795_s11 }
 0x167   :  { %727 = vrot.lane.b32.xlu1 %v457_v10, %s2789_s2 }
 0x16a   :  { %1115 = vrot.lane.b32.xlu0 %v384_v4, %s2791_s7 }
 0x16b   :  { %959 = vrot.lane.b32.xlu1 %v386_v7, %s2790_s6 }
 0x16e   :  { %1233 = vrot.lane.b32.xlu0 %v384_v4, %s2794_s10  ;;  %v1142_v4 = vld [vmem:[#allocation8 + $0x5] ss:$8 sm:$0xf0] }
 0x16f   :  { %963 = vrot.lane.b32.xlu1 %v457_v10, %s2790_s6 }
 0x172   :  { %1473 = vrot.lane.b32.xlu0 %v455_v6, %s2796_s12 }
 0x173   :  { %604 = vrot.lane.b32.xlu1 %v386_v7, %s2793_s9 }
 0x176   :  { %723 = vrot.lane.b32.xlu0 %v386_v7, %s2789_s2 }
 0x177   :  { %608 = vrot.lane.b32.xlu1 %v457_v10, %s2793_s9 }
 0x17a   :  { %1117 = vrot.lane.b32.xlu0 %v386_v7, %s2791_s7 }
 0x17b   :  { %841 = vrot.lane.b32.xlu1 %v386_v7, %s2795_s11 }
 0x17e   :  { %1121 = vrot.lane.b32.xlu0 %v457_v10, %s2791_s7 }
 0x17f   :  { %845 = vrot.lane.b32.xlu1 %v457_v10, %s2795_s11 }
 0x182   :  { %1353 = vrot.lane.b32.xlu0 %v386_v7, %s2792_s8 }
 0x183   :  { %1471 = vrot.lane.b32.xlu1 %v386_v7, %s2796_s12 }
 0x186   :  { %1357 = vrot.lane.b32.xlu0 %v457_v10, %s2792_s8 }
 0x187   :  { %1475 = vrot.lane.b32.xlu1 %v457_v10, %s2796_s12 }
 0x18a   :  { %1235 = vrot.lane.b32.xlu0 %v386_v7, %s2794_s10  ;;  %v640_v7 = vrot.slane %v3014_v62, %v2985_v44 }
 0x18d   :  { %v526_v15 = vpop.f32.mrb[2].mxu0 }
 0x18e   :  { %1079 = vst [vmem:[#allocation2 + $0x120] sm:$0xf] %v526_v15  ;;  %v1095_v12 = vrot.slane %v526_v15, 4  ;;  %1239 = vrot.lane.b32.xlu0 %v457_v10, %s2794_s10  ;;  %1123 = vrot.lane.b32.xlu1 %v526_v15, %s2791_s7  ;;  %v528_v13 = vpop.f32.mrb[3].mxu0  ;;  %v597_v14 = vpop.f32.mrb[2].mxu1  ;;  %v1668_v10 = vld [vmem:[%s3483_s4] sm:$0xff] }
 0x18f   :  { %1080 = vst [vmem:[#allocation2 + $0x128] sm:$0xf] %v528_v13  ;;  %v1096_v17 = vrot.slane %v528_v13, 4  ;;  %1081 = vst [vmem:[#allocation2 + $0x130] sm:$0xf] %v597_v14  ;;  %v1097_v18 = vrot.slane %v597_v14, 4 }
 0x190   :  { %v599_v19 = vpop.f32.mrb[3].mxu1  ;;  %1111 = vst [vmem:[#allocation2 + $0x160] sm:$0xf] %v1095_v12  ;;  %v3034_v12 = vsub.s32 0, %v2964_v31 }
 0x191   :  { %1082 = vst [vmem:[#allocation2 + $0x138] sm:$0xf] %v599_v19  ;;  %v1098_v20 = vrot.slane %v599_v19, 4  ;;  %1112 = vst [vmem:[#allocation2 + $0x168] sm:$0xf] %v1096_v17 }
 0x192   :  { %1113 = vst [vmem:[#allocation2 + $0x170] sm:$0xf] %v1097_v18  ;;  %965 = vrot.lane.b32.xlu0 %v526_v15, %s2790_s6  ;;  %1359 = vrot.lane.b32.xlu1 %v526_v15, %s2792_s8 }
 0x193   :  { %1114 = vst [vmem:[#allocation2 + $0x178] sm:$0xf] %v1098_v20 }
 0x196   :  { %969 = vrot.lane.b32.xlu0 %v597_v14, %s2790_s6  ;;  %1241 = vrot.lane.b32.xlu1 %v526_v15, %s2794_s10 }
 0x19a   :  { %847 = vrot.lane.b32.xlu0 %v526_v15, %s2795_s11  ;;  %729 = vrot.lane.b32.xlu1 %v526_v15, %s2789_s2 }
 0x19e   :  { %851 = vrot.lane.b32.xlu0 %v597_v14, %s2795_s11  ;;  %733 = vrot.lane.b32.xlu1 %v597_v14, %s2789_s2 }
 0x1a2   :  { %1477 = vrot.lane.b32.xlu0 %v526_v15, %s2796_s12  ;;  %610 = vrot.lane.b32.xlu1 %v526_v15, %s2793_s9  ;;  %v866_v15 = vld [vmem:[#allocation8 + $0x2] ss:$8 sm:$0xf0] }
 0x1a3   :  { %v3050_v41 = vor.u32 %v866_v15, %v865_v9 }
 0x1a6   :  { %1363 = vrot.lane.b32.xlu0 %v597_v14, %s2792_s8  ;;  %614 = vrot.lane.b32.xlu1 %v597_v14, %s2793_s9 }
 0x1aa   :  { %735 = vrot.lane.b32.xlu0 %v599_v19, %s2789_s2  ;;  %1127 = vrot.lane.b32.xlu1 %v597_v14, %s2791_s7 }
 0x1ae   :  { %616 = vrot.lane.b32.xlu0 %v599_v19, %s2793_s9  ;;  %1245 = vrot.lane.b32.xlu1 %v597_v14, %s2794_s10 }
 0x1b2   :  { %971 = vrot.lane.b32.xlu1 %v599_v19, %s2790_s6  ;;  %731 = vrot.lane.b32.xlu0 %v528_v13, %s2789_s2 }
 0x1b6   :  { %853 = vrot.lane.b32.xlu1 %v599_v19, %s2795_s11  ;;  %612 = vrot.lane.b32.xlu0 %v528_v13, %s2793_s9 }
 0x1ba   :  { %967 = vrot.lane.b32.xlu1 %v528_v13, %s2790_s6  ;;  %1125 = vrot.lane.b32.xlu0 %v528_v13, %s2791_s7 }
 0x1be   :  { %849 = vrot.lane.b32.xlu1 %v528_v13, %s2795_s11  ;;  %1129 = vrot.lane.b32.xlu0 %v599_v19, %s2791_s7 }
 0x1c0   :  { %v2941_v21 = vpop.permute.xlu0 %721 }
 0x1c1   :  { %v2945_v23 = vpop.permute.xlu1 %725 }
 0x1c2   :  { %1361 = vrot.lane.b32.xlu1 %v528_v13, %s2792_s8  ;;  %1243 = vrot.lane.b32.xlu0 %v528_v13, %s2794_s10 }
 0x1c4   :  { %v2949_v24 = vpop.permute.xlu0 %957 }
 0x1c5   :  { %v2951_v25 = vpop.permute.xlu1 %1119 }
 0x1c6   :  { %1365 = vrot.lane.b32.xlu1 %v599_v19, %s2792_s8  ;;  %1247 = vrot.lane.b32.xlu0 %v599_v19, %s2794_s10 }
 0x1c8   :  { %v962_v26 = vpop.permute.xlu0 %961 }
 0x1c9   :  { %v2955_v27 = vpop.permute.xlu1 %1355 }
 0x1ca   :  { %1479 = vrot.lane.b32.xlu1 %v528_v13, %s2796_s12  ;;  %1481 = vrot.lane.b32.xlu0 %v597_v14, %s2796_s12  ;;  %v3036_v13 = vor.u32 %v1142_v4, %v1141_v0  ;;  %v2798_v14 = vmov 0   ;;  %v880_v0 = vrot.slane %v3050_v41, %v2988_v45 }
 0x1cb   :  { %2689 = vset.pattern.permute.xlu0 %v2798_v14 }
 0x1cc   :  { %v2959_v29 = vpop.permute.xlu0 %602 }
 0x1cd   :  { %v2961_v30 = vpop.permute.xlu1 %1351 }
 0x1ce   :  { %1483 = vrot.lane.b32.xlu1 %v599_v19, %s2796_s12  ;;  %1671 = vperm.xlu0 %2689, %v1668_v10  }
 0x1d0   :  { %v2966_v32 = vpop.permute.xlu0 %606 }
 0x1d1   :  { %v2968_v35 = vpop.permute.xlu1 %1237 }
 0x1d4   :  { %v2977_v39 = vpop.permute.xlu0 %839 }
 0x1d5   :  { %v2979_v42 = vpop.permute.xlu1 %1469 }
 0x1d8   :  { %v2992_v47 = vpop.permute.xlu0 %843 }
 0x1d9   :  { %v2994_v48 = vpop.permute.xlu1 %727 }
 0x1da   :  { %v742_v49 = vsel %vm737_vm0, %v2945_v23, %v2994_v48 }
 0x1db   :  { %v794_v50 = vmul.f32 %v766_v43, %v742_v49  ;;  %v1148_v49 = vrot.slane %v3036_v13, %v3034_v12 }
 0x1dc   :  { %v3005_v53 = vpop.permute.xlu0 %1115 }
 0x1dd   :  { %v810_v55 = vrot.slane %v794_v50, 4  ;;  %834 = vst [vmem:[#allocation2 + $0x58] sm:$0xf0] %v794_v50  ;;  %v960_v56 = vpop.permute.xlu1 %959 }
 0x1de   :  { %v979_v57 = vsel %vm973_vm1, %v960_v56, %v962_v26  ;;  %v980_v58 = vsel %vm973_vm1, %v2949_v24, %v960_v56 }
 0x1df   :  { %826 = vst [vmem:[#allocation2 + $0x18] sm:$0xf0] %v810_v55  ;;  %v1028_v59 = vmul.f32 %v994_v51, %v980_v58  ;;  %v1029_v60 = vmul.f32 %v998_v52, %v979_v57  ;;  %v1152_v58 = vrot.slane %v3036_v13, %v2985_v44 }
 0x1e0   :  { %v3016_v63 = vpop.permute.xlu0 %1233 }
 0x1e1   :  { %v1044_v1 = vrot.slane %v1028_v59, 4  ;;  %v1045_v2 = vrot.slane %v1029_v60, 4  ;;  %1068 = vst [vmem:[#allocation2 + $0xc8] sm:$0xf0] %v1028_v59  ;;  %1069 = vst [vmem:[#allocation2 + $0xd0] sm:$0xf0] %v1029_v60  ;;  %v3018_v3 = vpop.permute.xlu1 %963 }
 0x1e2   :  { %v978_v5 = vsel %vm973_vm1, %v962_v26, %v3018_v3  ;;  %v758_v26 = vrot.slane %v2975_v38, %v2985_v44  ;;  %v1377_v59 = vld [vmem:[#allocation8 + $0x7] ss:$8 sm:$0xf] }
 0x1e3   :  { %1060 = vst [vmem:[#allocation2 + $0x88] sm:$0xf0] %v1044_v1  ;;  %1061 = vst [vmem:[#allocation2 + $0x90] sm:$0xf0] %v1045_v2  ;;  %v1030_v6 = vmul.f32 %v1002_v61, %v978_v5  ;;  %v1156_v5 = vrot.slane %v3036_v13, %v2988_v45 }
 0x1e4   :  { %v3031_v11 = vpop.permute.xlu0 %1473  ;;  %v1378_v60 = vld [vmem:[#allocation8 + $0x7] ss:$8 sm:$0xf0]  ;;  %v1495_v1 = vld [vmem:[#allocation8 + $0x40] ss:$8 sm:$0xf] }
 0x1e5   :  { %v1046_v17 = vrot.slane %v1030_v6, 4  ;;  %1070 = vst [vmem:[#allocation2 + $0xd8] sm:$0xf0] %v1030_v6  ;;  %v605_v18 = vpop.permute.xlu1 %604  ;;  %v1496_v6 = vld [vmem:[#allocation8 + $0x40] ss:$8 sm:$0xf0]  ;;  %v3082_v15 = vor.u32 %v1378_v60, %v1377_v59 }
 0x1e6   :  { %v626_v19 = vsel %vm620_vm2, %v605_v18, %v2966_v32  ;;  %v627_v20 = vsel %vm620_vm2, %v2959_v29, %v605_v18  ;;  %v1260_v59 = vld [vmem:[#allocation8 + $0x6] ss:$8 sm:$0xf0] }
 0x1e7   :  { %1062 = vst [vmem:[#allocation2 + $0x98] sm:$0xf0] %v1046_v17  ;;  %v674_v33 = vmul.f32 %v640_v7, %v627_v20  ;;  %v675_v34 = vmul.f32 %v644_v8, %v626_v19 }
 0x1e8   :  { %v724_v43 = vpop.permute.xlu0 %723 }
 0x1e9   :  { %682 = vst [vmem:[#allocation2 + $0x8] sm:$0xf] %v674_v33  ;;  %683 = vst [vmem:[#allocation2 + $0x10] sm:$0xf] %v675_v34  ;;  %v698_v50 = vrot.slane %v674_v33, 4  ;;  %v699_v51 = vrot.slane %v675_v34, 4  ;;  %v3055_v52 = vpop.permute.xlu1 %608  ;;  %v743_v16 = vsel %vm737_vm0, %v724_v43, %v2945_v23  ;;  %v744_v54 = vsel %vm737_vm0, %v2941_v21, %v724_v43 }
 0x1ea   :  { %v625_v55 = vsel %vm620_vm2, %v2966_v32, %v3055_v52  ;;  %v792_v56 = vmul.f32 %v758_v26, %v744_v54  ;;  %v793_v57 = vmul.f32 %v762_v28, %v743_v16  ;;  %v876_v23 = vrot.slane %v3050_v41, %v2985_v44 }
 0x1eb   :  { %714 = vst [vmem:[#allocation2 + $0x48] sm:$0xf] %v698_v50  ;;  %715 = vst [vmem:[#allocation2 + $0x50] sm:$0xf] %v699_v51  ;;  %v676_v61 = vmul.f32 %v648_v40, %v625_v55  ;;  %v884_v28 = vrot.slane %v3050_v41, %v2973_v37  ;;  %v3092_v33 = vor.u32 %v1496_v6, %v1495_v1 }
 0x1ec   :  { %v808_v32 = vrot.slane %v792_v56, 4  ;;  %v809_v2 = vrot.slane %v793_v57, 4  ;;  %832 = vst [vmem:[#allocation2 + $0x48] sm:$0xf0] %v792_v56  ;;  %833 = vst [vmem:[#allocation2 + $0x50] sm:$0xf0] %v793_v57  ;;  %v1118_v4 = vpop.permute.xlu0 %1117  ;;  %v1384_v56 = vrot.slane %v3082_v15, %v3034_v12  ;;  %v1388_v57 = vrot.slane %v3082_v15, %v2985_v44 }
 0x1ed   :  { %684 = vst [vmem:[#allocation2 + $0x18] sm:$0xf] %v676_v61  ;;  %v700_v7 = vrot.slane %v676_v61, 4  ;;  %v842_v8 = vpop.permute.xlu1 %841  ;;  %v1137_v9 = vsel %vm1131_vm3, %v1118_v4, %v2951_v25  ;;  %v1138_v10 = vsel %vm1131_vm3, %v3005_v53, %v1118_v4  ;;  %v1502_v60 = vrot.slane %v3092_v33, %v3034_v12 }
 0x1ee   :  { %824 = vst [vmem:[#allocation2 + $0x8] sm:$0xf0] %v808_v32  ;;  %825 = vst [vmem:[#allocation2 + $0x10] sm:$0xf0] %v809_v2  ;;  %v861_v14 = vsel %vm855_vm4, %v842_v8, %v2992_v47  ;;  %v862_v17 = vsel %vm855_vm4, %v2977_v39, %v842_v8  ;;  %v1185_v18 = vmul.f32 %v1148_v49, %v1138_v10 }
 0x1ef   :  { %v1186_v19 = vmul.f32 %v1152_v58, %v1137_v9  ;;  %716 = vst [vmem:[#allocation2 + $0x58] sm:$0xf] %v700_v7  ;;  %v910_v20 = vmul.f32 %v876_v23, %v862_v17  ;;  %v911_v26 = vmul.f32 %v880_v0, %v861_v14  ;;  %v1259_v58 = vld [vmem:[#allocation8 + $0x6] ss:$8 sm:$0xf]  ;;  %v1392_v0 = vrot.slane %v3082_v15, %v2988_v45 }
 0x1f0   :  { %v1201_v34 = vrot.slane %v1185_v18, 4  ;;  %1225 = vst [vmem:[#allocation2 + $0x140] sm:$0xf0] %v1185_v18  ;;  %v3094_v43 = vpop.permute.xlu0 %1121  ;;  %v1510_v17 = vrot.slane %v3092_v33, %v2988_v45 }
 0x1f1   :  { %v1202_v40 = vrot.slane %v1186_v19, 4  ;;  %1226 = vst [vmem:[#allocation2 + $0x148] sm:$0xf0] %v1186_v19  ;;  %918 = vst [vmem:[#allocation2 + $0x88] sm:$0xf] %v910_v20  ;;  %v934_v50 = vrot.slane %v910_v20, 4  ;;  %v3096_v49 = vpop.permute.xlu1 %845  ;;  %v1136_v16 = vsel %vm1131_vm3, %v2951_v25, %v3094_v43 }
 0x1f2   :  { %919 = vst [vmem:[#allocation2 + $0x90] sm:$0xf] %v911_v26  ;;  %v935_v51 = vrot.slane %v911_v26, 4  ;;  %1217 = vst [vmem:[#allocation2 + $0x100] sm:$0xf0] %v1201_v34  ;;  %v860_v54 = vsel %vm855_vm4, %v2992_v47, %v3096_v49  ;;  %v1187_v55 = vmul.f32 %v1156_v5, %v1136_v16  ;;  %v1506_v47 = vrot.slane %v3092_v33, %v2985_v44 }
 0x1f3   :  { %1218 = vst [vmem:[#allocation2 + $0x108] sm:$0xf0] %v1202_v40  ;;  %950 = vst [vmem:[#allocation2 + $0xc8] sm:$0xf] %v934_v50  ;;  %v912_v25 = vmul.f32 %v884_v28, %v860_v54  ;;  %v3124_v5 = vor.u32 %v1260_v59, %v1259_v58 }
 0x1f4   :  { %951 = vst [vmem:[#allocation2 + $0xd0] sm:$0xf] %v935_v51  ;;  %v1203_v61 = vrot.slane %v1187_v55, 4  ;;  %1227 = vst [vmem:[#allocation2 + $0x150] sm:$0xf0] %v1187_v55  ;;  %v1354_v23 = vpop.permute.xlu0 %1353 }
 0x1f5   :  { %920 = vst [vmem:[#allocation2 + $0x98] sm:$0xf] %v912_v25  ;;  %v936_v1 = vrot.slane %v912_v25, 4  ;;  %v1472_v32 = vpop.permute.xlu1 %1471  ;;  %v1373_v2 = vsel %vm1367_vm5, %v1354_v23, %v2955_v27  ;;  %v1374_v4 = vsel %vm1367_vm5, %v2961_v30, %v1354_v23  ;;  %v1589_v26 = vld [vmem:[#allocation2 + $0x8] sm:$0xff] }
 0x1f6   :  { %1219 = vst [vmem:[#allocation2 + $0x110] sm:$0xf0] %v1203_v61  ;;  %v1491_v6 = vsel %vm1485_vm6, %v1472_v32, %v3031_v11  ;;  %v1492_v7 = vsel %vm1485_vm6, %v2979_v42, %v1472_v32  ;;  %v1421_v8 = vmul.f32 %v1384_v56, %v1374_v4  ;;  %v1422_v9 = vmul.f32 %v1388_v57, %v1373_v2  ;;  %v1590_v32 = vld [vmem:[#allocation2 + $0x10] sm:$0xff] }
 0x1f7   :  { %952 = vst [vmem:[#allocation2 + $0xd8] sm:$0xf] %v936_v1  ;;  %v1539_v10 = vmul.f32 %v1502_v60, %v1492_v7  ;;  %v1540_v14 = vmul.f32 %v1506_v47, %v1491_v6  ;;  %v1266_v56 = vrot.slane %v3124_v5, %v3034_v12  ;;  %v1270_v57 = vrot.slane %v3124_v5, %v2985_v44  ;;  %v1591_v60 = vld [vmem:[#allocation2 + $0x18] sm:$0xff] }
 0x1f8   :  { %v1437_v18 = vrot.slane %v1421_v8, 4  ;;  %v1438_v19 = vrot.slane %v1422_v9, 4  ;;  %1461 = vst [vmem:[#allocation2 + $0x1c0] sm:$0xf0] %v1421_v8  ;;  %1462 = vst [vmem:[#allocation2 + $0x1c8] sm:$0xf0] %v1422_v9  ;;  %v3134_v20 = vpop.permute.xlu0 %1357  ;;  %v1160_v61 = vrot.slane %v3036_v13, %v2973_v37 }
 0x1f9   :  { %v1605_v28 = vld [vmem:[#allocation2 + $0x88] sm:$0xff]  ;;  %1547 = vst [vmem:[#allocation2 + $0x200] sm:$0xf] %v1539_v10  ;;  %1548 = vst [vmem:[#allocation2 + $0x208] sm:$0xf] %v1540_v14  ;;  %v1563_v34 = vrot.slane %v1539_v10, 4  ;;  %v3137_v50 = vpop.permute.xlu1 %1475  ;;  %v1372_v51 = vsel %vm1367_vm5, %v2955_v27, %v3134_v20 }
 0x1fa   :  { %v1564_v40 = vrot.slane %v1540_v14, 4  ;;  %v2609_v16 = vpack.c.bf16 %v1605_v28, %v1589_v26  ;;  %1453 = vst [vmem:[#allocation2 + $0x180] sm:$0xf0] %v1437_v18  ;;  %1454 = vst [vmem:[#allocation2 + $0x188] sm:$0xf0] %v1438_v19  ;;  %v1490_v54 = vsel %vm1485_vm6, %v3031_v11, %v3137_v50  ;;  %v1423_v55 = vmul.f32 %v1392_v0, %v1372_v51  ;;  %v1606_v27 = vld [vmem:[#allocation2 + $0x90] sm:$0xff] }
 0x1fb   :  { %1579 = vst [vmem:[#allocation2 + $0x240] sm:$0xf] %v1563_v34  ;;  %v1541_v58 = vmul.f32 %v1510_v17, %v1490_v54  ;;  %v1274_v11 = vrot.slane %v3124_v5, %v2988_v45  ;;  %v2619_v6 = vpack.c.bf16 %v1606_v27, %v1590_v32  ;;  %v3162_v45 = vsub.s32 4, %v2964_v31 }
 0x1fc   :  { %1580 = vst [vmem:[#allocation2 + $0x248] sm:$0xf] %v1564_v40  ;;  %2610 = vmatprep.subr.bf16.mxu0 %v2609_v16  ;;  %v1439_v59 = vrot.slane %v1423_v55, 4  ;;  %1463 = vst [vmem:[#allocation2 + $0x1d0] sm:$0xf0] %v1423_v55  ;;  %v1236_v25 = vpop.permute.xlu0 %1235  ;;  %v1607_v47 = vld [vmem:[#allocation2 + $0x98] sm:$0xff]  ;;  %v1396_v28 = vrot.slane %v3082_v15, %v2973_v37 }
 0x1fd   :  { %1549 = vst [vmem:[#allocation2 + $0x210] sm:$0xf] %v1541_v58  ;;  %v1565_v23 = vrot.slane %v1541_v58, 4  ;;  %v1255_v44 = vsel %vm1249_vm7, %v1236_v25, %v2968_v35  ;;  %v1256_v0 = vsel %vm1249_vm7, %v3016_v63, %v1236_v25  ;;  %v2617_v1 = vpack.c.bf16 %v1607_v47, %v1591_v60 }
 0x1fe   :  { %1455 = vst [vmem:[#allocation2 + $0x190] sm:$0xf0] %v1439_v59  ;;  %v1303_v2 = vmul.f32 %v1266_v56, %v1256_v0  ;;  %v1304_v4 = vmul.f32 %v1270_v57, %v1255_v44  ;;  %v1006_v26 = vrot.slane %v2990_v46, %v3162_v45  ;;  %v1278_v56 = vrot.slane %v3124_v5, %v2973_v37 }
 0x1ff   :  { %1581 = vst [vmem:[#allocation2 + $0x250] sm:$0xf] %v1565_v23  ;;  %2618 = vmatprep.subr.bf16.mxu1 %v2617_v1  ;;  %v888_v25 = vrot.slane %v3050_v41, %v3162_v45  ;;  %v770_v60 = vrot.slane %v2975_v38, %v3162_v45 }
 0x200   :  { %1311 = vst [vmem:[#allocation2 + $0x180] sm:$0xf] %v1303_v2  ;;  %1312 = vst [vmem:[#allocation2 + $0x188] sm:$0xf] %v1304_v4  ;;  %v1327_v7 = vrot.slane %v1303_v2, 4  ;;  %v1328_v8 = vrot.slane %v1304_v4, 4  ;;  %2620 = vmatpush1.bf16.msra.mxu1 %v2619_v6  ;;  %v1240_v9 = vpop.permute.xlu0 %1239  ;;  %v3164_v10 = vpop.permute.xlu1 %1123 }
 0x201   :  { %v1254_v14 = vsel %vm1249_vm7, %v2968_v35, %v1240_v9  ;;  %v1135_v17 = vsel %vm1131_vm3, %v3094_v43, %v3164_v10 }
 0x202   :  { %1343 = vst [vmem:[#allocation2 + $0x1c0] sm:$0xf] %v1327_v7  ;;  %1344 = vst [vmem:[#allocation2 + $0x1c8] sm:$0xf] %v1328_v8  ;;  %v1305_v18 = vmul.f32 %v1274_v11, %v1254_v14  ;;  %v1188_v19 = vmul.f32 %v1160_v61, %v1135_v17  ;;  %v652_v7 = vrot.slane %v3014_v62, %v3162_v45 }
 0x204   :  { %1313 = vst [vmem:[#allocation2 + $0x190] sm:$0xf] %v1305_v18  ;;  %v1329_v34 = vrot.slane %v1305_v18, 4  ;;  %v1204_v40 = vrot.slane %v1188_v19, 4  ;;  %1228 = vst [vmem:[#allocation2 + $0x158] sm:$0xf0] %v1188_v19  ;;  %v3177_v35 = vpop.permute.xlu0 %965  ;;  %v3179_v51 = vpop.permute.xlu1 %1359 }
 0x205   :  { %v977_v43 = vsel %vm973_vm1, %v3018_v3, %v3177_v35  ;;  %v1371_v16 = vsel %vm1367_vm5, %v3134_v20, %v3179_v51  ;;  %v1622_v19 = vld [vmem:[#allocation2 + $0x110] sm:$0xff] }
 0x206   :  { %1345 = vst [vmem:[#allocation2 + $0x1d0] sm:$0xf] %v1329_v34  ;;  %1220 = vst [vmem:[#allocation2 + $0x118] sm:$0xf0] %v1204_v40  ;;  %v1031_v54 = vmul.f32 %v1006_v26, %v977_v43  ;;  %v1424_v55 = vmul.f32 %v1396_v28, %v1371_v16  ;;  %v3235_v43 = vsub.s32 7, %v2964_v31 }
 0x208   :  { %v1047_v57 = vrot.slane %v1031_v54, 4  ;;  %1071 = vst [vmem:[#allocation2 + $0xe0] sm:$0xf0] %v1031_v54  ;;  %v1440_v58 = vrot.slane %v1424_v55, 4  ;;  %1464 = vst [vmem:[#allocation2 + $0x1d8] sm:$0xf0] %v1424_v55  ;;  %v3191_v27 = vpop.permute.xlu0 %969  ;;  %v3193_v59 = vpop.permute.xlu1 %1241 }
 0x209   :  { %v1253_v3 = vsel %vm1249_vm7, %v1240_v9, %v3193_v59 }
 0x20a   :  { %1063 = vst [vmem:[#allocation2 + $0xa0] sm:$0xf0] %v1047_v57  ;;  %1456 = vst [vmem:[#allocation2 + $0x198] sm:$0xf0] %v1440_v58  ;;  %v1306_v20 = vmul.f32 %v1278_v56, %v1253_v3  ;;  %v782_v56 = vrot.slane %v2975_v38, %v3235_v43 }
 0x20c   :  { %1314 = vst [vmem:[#allocation2 + $0x198] sm:$0xf] %v1306_v20  ;;  %v1330_v47 = vrot.slane %v1306_v20, 4  ;;  %v3202_v11 = vpop.permute.xlu0 %847  ;;  %v3204_v61 = vpop.permute.xlu1 %729 }
 0x20d   :  { %v859_v23 = vsel %vm855_vm4, %v3096_v49, %v3202_v11  ;;  %v741_v44 = vsel %vm737_vm0, %v2994_v48, %v3204_v61  ;;  %v1514_v49 = vrot.slane %v3092_v33, %v2973_v37  ;;  %v1638_v48 = vld [vmem:[#allocation2 + $0x190] sm:$0xff]  ;;  %v1623_v8 = vld [vmem:[#allocation2 + $0x118] sm:$0xff] }
 0x20e   :  { %1346 = vst [vmem:[#allocation2 + $0x1d8] sm:$0xf] %v1330_v47  ;;  %v913_v0 = vmul.f32 %v888_v25, %v859_v23  ;;  %v795_v1 = vmul.f32 %v770_v60, %v741_v44  ;;  %v2623_v28 = vpack.c.bf16 %v1638_v48, %v1622_v19  ;;  %v636_v25 = vrot.slane %v3014_v62, %v3034_v12  ;;  %v1654_v48 = vld [vmem:[#allocation2 + $0x210] sm:$0xf] }
 0x20f   :  { %v664_v60 = vrot.slane %v3014_v62, %v3235_v43  ;;  %v3258_v44 = vsub.s32 5, %v2964_v31 }
 0x210   :  { %921 = vst [vmem:[#allocation2 + $0xa0] sm:$0xf] %v913_v0  ;;  %v937_v32 = vrot.slane %v913_v0, 4  ;;  %v811_v2 = vrot.slane %v795_v1, 4  ;;  %835 = vst [vmem:[#allocation2 + $0x60] sm:$0xf0] %v795_v1  ;;  %v3214_v4 = vpop.permute.xlu0 %851  ;;  %v3216_v6 = vpop.permute.xlu1 %733 }
 0x211   :  { %v3261_v0 = vsub.s32 6, %v2964_v31 }
 0x212   :  { %953 = vst [vmem:[#allocation2 + $0xe0] sm:$0xf] %v937_v32  ;;  %827 = vst [vmem:[#allocation2 + $0x20] sm:$0xf0] %v811_v2  ;;  %v3266_v32 = vld [vmem:[%s3482_s3] sm:$0xff]  ;;  %s2799_s3 = smov [#allocation9]  }
 0x213   :  { %v1639_v9 = vld [vmem:[#allocation2 + $0x198] sm:$0xff]  ;;  %s2316_s16 = sshll.u32 %s2799_s3, 4  ;;  %s2317_s16 = int_to_ptr.vmem [resolvable:$true] %s2316_s16 }
 0x214   :  { %v3222_v14 = vpop.permute.xlu0 %1477  ;;  %v3224_v17 = vpop.permute.xlu1 %610  ;;  %v2621_v18 = vpack.c.bf16 %v1639_v9, %v1623_v8  ;;  %v990_v9 = vrot.slane %v2990_v46, %v3034_v12  ;;  %s2756_s17 = scalar_lea.vmem %s2317_s16, 2048  ;;  %p2761_p11 = scmp.lt.s32.totalorder %s2317_s16, %s2317_s16 }
 0x215   :  { %v1489_v26 = vsel %vm1485_vm6, %v3137_v50, %v3222_v14  ;;  %v624_v37 = vsel %vm620_vm2, %v3055_v52, %v3224_v17  ;;  %v754_v52 = vrot.slane %v2975_v38, %v3034_v12  ;;  %p2757_p10 = scmp.ne.s32.totalorder %s2317_s16, %s2756_s17  ;;  %p2762_p12 = scmp.lt.s32.totalorder %s2756_s17, %s2756_s17 }
 0x216   :  { %v1542_v34 = vmul.f32 %v1514_v49, %v1489_v26  ;;  %v677_v40 = vmul.f32 %v652_v7, %v624_v37  ;;  %2622 = vmatprep.subr.bf16.mxu1 %v2621_v18  ;;  %v1018_v18 = vrot.slane %v2990_v46, %v3235_v43  ;;  %v774_v37 = vrot.slane %v2975_v38, %v3258_v44 }
 0x217   :  { %2624 = vmatpush1.bf16.msra.mxu1 %v2623_v28  ;;  %v778_v28 = vrot.slane %v2975_v38, %v3261_v0  ;;  %p2763_p13 = por %p2762_p12, %p2761_p11 }
 0x218   :  { %1550 = vst [vmem:[#allocation2 + $0x218] sm:$0xf] %v1542_v34  ;;  %v1566_v16 = vrot.slane %v1542_v34, 4  ;;  %685 = vst [vmem:[#allocation2 + $0x20] sm:$0xf] %v677_v40  ;;  %v701_v54 = vrot.slane %v677_v40, 4  ;;  %v3237_v55 = vpop.permute.xlu0 %1363  ;;  %v3239_v50 = vpop.permute.xlu1 %614  ;;  %v900_v34 = vrot.slane %v3050_v41, %v3235_v43  ;;  %v656_v40 = vrot.slane %v3014_v62, %v3258_v44 }
 0x219   :  { %p2764_p0 = pnand %p2763_p13, %p2757_p10 }
 0x21a   :  { %1582 = vst [vmem:[#allocation2 + $0x258] sm:$0xf] %v1566_v16  ;;  %717 = vst [vmem:[#allocation2 + $0x60] sm:$0xf] %v701_v54 }
 0x21c   :  { %v736_v57 = vpop.permute.xlu0 %735  ;;  %v3245_v58 = vpop.permute.xlu1 %1127 }
 0x21d   :  { %v738_v3 = vsel %vm737_vm0, %v3216_v6, %v736_v57  ;;  %v745_v20 = vsel %vm737_vm0, %v736_v57, %v2941_v21 }
 0x21e   :  { %v791_v47 = vmul.f32 %v754_v52, %v745_v20  ;;  %v798_v23 = vmul.f32 %v782_v56, %v738_v3  ;;  %v660_v56 = vrot.slane %v3014_v62, %v3261_v0 }
 0x21f   :  { %v1655_v1 = vld [vmem:[#allocation2 + $0x218] sm:$0xf] }
 0x220   :  { %v807_v21 = vrot.slane %v791_v47, 4  ;;  %v814_v2 = vrot.slane %v798_v23, 4  ;;  %831 = vst [vmem:[#allocation2 + $0x40] sm:$0xf0] %v791_v47  ;;  %838 = vst [vmem:[#allocation2 + $0x78] sm:$0xf0] %v798_v23  ;;  %v617_v49 = vpop.permute.xlu0 %616  ;;  %2332 = vmatprep.subr.msk.mxu1 %vm1678_vm8, %v1655_v1  ;;  %v3269_v7 = vpop.permute.xlu1 %1245  ;;  %v1014_v1 = vrot.slane %v2990_v46, %v3261_v0 }
 0x221   :  { %v621_v31 = vsel %vm620_vm2, %v3239_v50, %v617_v49  ;;  %v628_v8 = vsel %vm620_vm2, %v617_v49, %v2959_v29  ;;  %2333 = vmatpush1.msk.msra.mxu1 %vm1678_vm8, %v1654_v48  ;;  %v872_v29 = vrot.slane %v3050_v41, %v3034_v12  ;;  %v1010_v12 = vrot.slane %v2990_v46, %v3258_v44 }
 0x222   :  { %823 = vst [vmem:[#allocation2] sm:$0xf0] %v807_v21  ;;  %830 = vst [vmem:[#allocation2 + $0x38] sm:$0xf0] %v814_v2  ;;  %v673_v19 = vmul.f32 %v636_v25, %v628_v8  ;;  %v680_v26 = vmul.f32 %v664_v60, %v621_v31  ;;  %2334 = vmatmul.mubr.msk.f32.vlgmr.msra.gmra.mrb[4].mxu1 %vm1674_vm9, %v3266_v32  ;;  %v1168_v21 = vrot.slane %v3036_v13, %v3258_v44 }
 0x223   :  { %2004 = vmatprep.mubr.f32.mxu1 %v2797_v22 }
 0x224   :  { %681 = vst [vmem:[#allocation2] sm:$0xf] %v673_v19  ;;  %688 = vst [vmem:[#allocation2 + $0x38] sm:$0xf] %v680_v26  ;;  %v697_v16 = vrot.slane %v673_v19, 4  ;;  %v704_v54 = vrot.slane %v680_v26, 4  ;;  %v972_v52 = vpop.permute.xlu1 %971  ;;  %v732_v38 = vpop.permute.xlu0 %731 }
 0x225   :  { %v974_v57 = vsel %vm973_vm1, %v3191_v27, %v972_v52  ;;  %v981_v3 = vsel %vm973_vm1, %v972_v52, %v2949_v24  ;;  %v739_v20 = vsel %vm737_vm0, %v732_v38, %v3216_v6  ;;  %v740_v25 = vsel %vm737_vm0, %v3204_v61, %v732_v38 }
 0x226   :  { %713 = vst [vmem:[#allocation2 + $0x40] sm:$0xf] %v697_v16  ;;  %720 = vst [vmem:[#allocation2 + $0x78] sm:$0xf] %v704_v54  ;;  %v1027_v62 = vmul.f32 %v990_v9, %v981_v3  ;;  %v1034_v60 = vmul.f32 %v1018_v18, %v974_v57  ;;  %v796_v47 = vmul.f32 %v774_v37, %v740_v25 }
 0x227   :  { %v797_v23 = vmul.f32 %v778_v28, %v739_v20  ;;  %v1164_v24 = vrot.slane %v3036_v13, %v3162_v45  ;;  %v892_v6 = vrot.slane %v3050_v41, %v3258_v44  ;;  %v896_v54 = vrot.slane %v3050_v41, %v3261_v0 }
 0x228   :  { %v1043_v2 = vrot.slane %v1027_v62, 4  ;;  %v1050_v61 = vrot.slane %v1034_v60, 4  ;;  %1067 = vst [vmem:[#allocation2 + $0xc0] sm:$0xf0] %v1027_v62  ;;  %1074 = vst [vmem:[#allocation2 + $0xf8] sm:$0xf0] %v1034_v60  ;;  %v854_v31 = vpop.permute.xlu1 %853  ;;  %v613_v8 = vpop.permute.xlu0 %612 }
 0x229   :  { %v812_v49 = vrot.slane %v796_v47, 4  ;;  %v813_v48 = vrot.slane %v797_v23, 4  ;;  %836 = vst [vmem:[#allocation2 + $0x68] sm:$0xf0] %v796_v47  ;;  %837 = vst [vmem:[#allocation2 + $0x70] sm:$0xf0] %v797_v23  ;;  %v856_v46 = vsel %vm855_vm4, %v3214_v4, %v854_v31  ;;  %v863_v9 = vsel %vm855_vm4, %v854_v31, %v2977_v39 }
 0x22a   :  { %v622_v18 = vsel %vm620_vm2, %v613_v8, %v3239_v50  ;;  %v623_v19 = vsel %vm620_vm2, %v3224_v17, %v613_v8  ;;  %1059 = vst [vmem:[#allocation2 + $0x80] sm:$0xf0] %v1043_v2  ;;  %1066 = vst [vmem:[#allocation2 + $0xb8] sm:$0xf0] %v1050_v61  ;;  %v909_v26 = vmul.f32 %v872_v29, %v863_v9 }
 0x22b   :  { %828 = vst [vmem:[#allocation2 + $0x28] sm:$0xf0] %v812_v49  ;;  %829 = vst [vmem:[#allocation2 + $0x30] sm:$0xf0] %v813_v48  ;;  %v916_v37 = vmul.f32 %v900_v34, %v856_v46  ;;  %v678_v28 = vmul.f32 %v656_v40, %v623_v19  ;;  %v679_v16 = vmul.f32 %v660_v56, %v622_v18 }
 0x22c   :  { %v1172_v39 = vrot.slane %v3036_v13, %v3261_v0  ;;  %v1176_v50 = vrot.slane %v3036_v13, %v3235_v43  ;;  %v1400_v17 = vrot.slane %v3082_v15, %v3162_v45  ;;  %917 = vst [vmem:[#allocation2 + $0x80] sm:$0xf] %v909_v26  ;;  %v933_v52 = vrot.slane %v909_v26, 4  ;;  %v968_v40 = vpop.permute.xlu1 %967  ;;  %v1126_v56 = vpop.permute.xlu0 %1125 }
 0x22d   :  { %924 = vst [vmem:[#allocation2 + $0xb8] sm:$0xf] %v916_v37  ;;  %v940_v38 = vrot.slane %v916_v37, 4  ;;  %686 = vst [vmem:[#allocation2 + $0x28] sm:$0xf] %v678_v28  ;;  %v702_v29 = vrot.slane %v678_v28, 4  ;;  %v975_v57 = vsel %vm973_vm1, %v968_v40, %v3191_v27  ;;  %v976_v13 = vsel %vm973_vm1, %v3177_v35, %v968_v40 }
 0x22e   :  { %687 = vst [vmem:[#allocation2 + $0x30] sm:$0xf] %v679_v16  ;;  %v703_v34 = vrot.slane %v679_v16, 4  ;;  %v1133_v3 = vsel %vm1131_vm3, %v1126_v56, %v3245_v58  ;;  %v1134_v20 = vsel %vm1131_vm3, %v3164_v10, %v1126_v56  ;;  %949 = vst [vmem:[#allocation2 + $0xc0] sm:$0xf] %v933_v52  ;;  %v1032_v25 = vmul.f32 %v1010_v12, %v976_v13  ;;  %v1595_v13 = vld [vmem:[#allocation2 + $0x38] sm:$0xff] }
 0x22f   :  { %956 = vst [vmem:[#allocation2 + $0xf8] sm:$0xf] %v940_v38  ;;  %718 = vst [vmem:[#allocation2 + $0x68] sm:$0xf] %v702_v29  ;;  %v1033_v62 = vmul.f32 %v1014_v1, %v975_v57  ;;  %v1189_v60 = vmul.f32 %v1164_v24, %v1134_v20  ;;  %v1190_v27 = vmul.f32 %v1168_v21, %v1133_v3  ;;  %v1621_v3 = vld [vmem:[#allocation2 + $0x108] sm:$0xff] }
 0x230   :  { %719 = vst [vmem:[#allocation2 + $0x70] sm:$0xf] %v703_v34  ;;  %v1404_v47 = vrot.slane %v3082_v15, %v3258_v44  ;;  %v1282_v35 = vrot.slane %v3124_v5, %v3162_v45  ;;  %v1286_v23 = vrot.slane %v3124_v5, %v3258_v44  ;;  %v1408_v10 = vrot.slane %v3082_v15, %v3261_v0  ;;  %v850_v24 = vpop.permute.xlu1 %849  ;;  %v1130_v21 = vpop.permute.xlu0 %1129 }
 0x231   :  { %v1048_v2 = vrot.slane %v1032_v25, 4  ;;  %v1049_v61 = vrot.slane %v1033_v62, 4  ;;  %1072 = vst [vmem:[#allocation2 + $0xe8] sm:$0xf0] %v1032_v25  ;;  %1073 = vst [vmem:[#allocation2 + $0xf0] sm:$0xf0] %v1033_v62  ;;  %v857_v49 = vsel %vm855_vm4, %v850_v24, %v3214_v4  ;;  %v858_v48 = vsel %vm855_vm4, %v3202_v11, %v850_v24 }
 0x232   :  { %v1205_v12 = vrot.slane %v1189_v60, 4  ;;  %v1206_v1 = vrot.slane %v1190_v27, 4  ;;  %1229 = vst [vmem:[#allocation2 + $0x160] sm:$0xf0] %v1189_v60  ;;  %1230 = vst [vmem:[#allocation2 + $0x168] sm:$0xf0] %v1190_v27  ;;  %v1132_v31 = vsel %vm1131_vm3, %v3245_v58, %v1130_v21  ;;  %v1139_v8 = vsel %vm1131_vm3, %v1130_v21, %v3005_v53 }
 0x233   :  { %1064 = vst [vmem:[#allocation2 + $0xa8] sm:$0xf0] %v1048_v2  ;;  %1065 = vst [vmem:[#allocation2 + $0xb0] sm:$0xf0] %v1049_v61  ;;  %v914_v4 = vmul.f32 %v892_v6, %v858_v48  ;;  %v915_v46 = vmul.f32 %v896_v54, %v857_v49  ;;  %v1191_v9 = vmul.f32 %v1172_v39, %v1132_v31  ;;  %v1637_v11 = vld [vmem:[#allocation2 + $0x188] sm:$0xff]  ;;  %v1604_v39 = vld [vmem:[#allocation2 + $0x80] sm:$0xff] }
 0x234   :  { %1221 = vst [vmem:[#allocation2 + $0x120] sm:$0xf0] %v1205_v12  ;;  %1222 = vst [vmem:[#allocation2 + $0x128] sm:$0xf0] %v1206_v1  ;;  %v1192_v18 = vmul.f32 %v1176_v50, %v1139_v8  ;;  %v1412_v19 = vrot.slane %v3082_v15, %v3235_v43  ;;  %v1290_v58 = vrot.slane %v3124_v5, %v3261_v0  ;;  %v1362_v16 = vpop.permute.xlu1 %1361  ;;  %v1244_v54 = vpop.permute.xlu0 %1243  ;;  %v1611_v50 = vld [vmem:[#allocation2 + $0xb8] sm:$0xff] }
 0x235   :  { %v1294_v53 = vrot.slane %v3124_v5, %v3235_v43  ;;  %v1518_v26 = vrot.slane %v3092_v33, %v3162_v45  ;;  %922 = vst [vmem:[#allocation2 + $0xa8] sm:$0xf] %v914_v4  ;;  %923 = vst [vmem:[#allocation2 + $0xb0] sm:$0xf] %v915_v46  ;;  %v938_v41 = vrot.slane %v914_v4, 4  ;;  %v939_v6 = vrot.slane %v915_v46, 4 }
 0x236   :  { %v1207_v37 = vrot.slane %v1191_v9, 4  ;;  %v1208_v28 = vrot.slane %v1192_v18, 4  ;;  %1231 = vst [vmem:[#allocation2 + $0x170] sm:$0xf0] %v1191_v9  ;;  %1232 = vst [vmem:[#allocation2 + $0x178] sm:$0xf0] %v1192_v18  ;;  %v1369_v52 = vsel %vm1367_vm5, %v1362_v16, %v3237_v55  ;;  %v1370_v5 = vsel %vm1367_vm5, %v3179_v51, %v1362_v16 }
 0x237   :  { %v1251_v38 = vsel %vm1249_vm7, %v1244_v54, %v3269_v7  ;;  %v1252_v29 = vsel %vm1249_vm7, %v3193_v59, %v1244_v54  ;;  %954 = vst [vmem:[#allocation2 + $0xe8] sm:$0xf] %v938_v41  ;;  %955 = vst [vmem:[#allocation2 + $0xf0] sm:$0xf] %v939_v6  ;;  %v1425_v34 = vmul.f32 %v1400_v17, %v1370_v5  ;;  %v1588_v51 = vld [vmem:[#allocation2] sm:$0xff]  ;;  %v1594_v31 = vld [vmem:[#allocation2 + $0x30] sm:$0xff] }
 0x238   :  { %1223 = vst [vmem:[#allocation2 + $0x130] sm:$0xf0] %v1207_v37  ;;  %1224 = vst [vmem:[#allocation2 + $0x138] sm:$0xf0] %v1208_v28  ;;  %v1426_v40 = vmul.f32 %v1404_v47, %v1369_v52  ;;  %v1307_v56 = vmul.f32 %v1282_v35, %v1252_v29  ;;  %v1308_v57 = vmul.f32 %v1286_v23, %v1251_v38  ;;  %v1366_v47 = vpop.permute.xlu1 %1365  ;;  %v1248_v35 = vpop.permute.xlu0 %1247  ;;  %v1636_v23 = vld [vmem:[#allocation2 + $0x180] sm:$0xff] }
 0x239   :  { %v2611_v20 = vpack.c.bf16 %v1604_v39, %v1588_v51  ;;  %v2633_v25 = vpack.c.bf16 %v1611_v50, %v1595_v13  ;;  %v2613_v62 = vpack.c.bf16 %v1637_v11, %v1621_v3  ;;  %v1522_v59 = vrot.slane %v3092_v33, %v3258_v44  ;;  %1465 = vst [vmem:[#allocation2 + $0x1e0] sm:$0xf0] %v1425_v34  ;;  %v1652_v39 = vld [vmem:[#allocation2 + $0x200] sm:$0xf] }
 0x23a   :  { %v1441_v60 = vrot.slane %v1425_v34, 4  ;;  %v1442_v27 = vrot.slane %v1426_v40, 4  ;;  %1466 = vst [vmem:[#allocation2 + $0x1e8] sm:$0xf0] %v1426_v40  ;;  %1315 = vst [vmem:[#allocation2 + $0x1a0] sm:$0xf] %v1307_v56  ;;  %v1368_v61 = vsel %vm1367_vm5, %v3237_v55, %v1366_v47  ;;  %v1375_v44 = vsel %vm1367_vm5, %v1366_v47, %v2961_v30 }
 0x23b   :  { %1316 = vst [vmem:[#allocation2 + $0x1a8] sm:$0xf] %v1308_v57  ;;  %v1331_v2 = vrot.slane %v1307_v56, 4  ;;  %v1332_v17 = vrot.slane %v1308_v57, 4  ;;  %2612 = vmatpush1.bf16.msra.mxu0 %v2611_v20  ;;  %2634 = vmatprep.subr.bf16.mxu1 %v2633_v25  ;;  %v1250_v12 = vsel %vm1249_vm7, %v3269_v7, %v1248_v35  ;;  %v1427_v1 = vmul.f32 %v1408_v10, %v1368_v61  ;;  %v1620_v30 = vld [vmem:[#allocation2 + $0x100] sm:$0xff]  ;;  %v1645_v47 = vld [vmem:[#allocation2 + $0x1c8] sm:$0xff] }
 0x23c   :  { %1457 = vst [vmem:[#allocation2 + $0x1a0] sm:$0xf0] %v1441_v60  ;;  %1458 = vst [vmem:[#allocation2 + $0x1a8] sm:$0xf0] %v1442_v27  ;;  %2614 = vmatprep.subr.bf16.mxu0 %v2613_v62  ;;  %v1428_v24 = vmul.f32 %v1412_v19, %v1375_v44  ;;  %v1257_v55 = vsel %vm1249_vm7, %v1248_v35, %v3016_v63  ;;  %v1309_v21 = vmul.f32 %v1290_v58, %v1250_v12  ;;  %v1610_v7 = vld [vmem:[#allocation2 + $0xb0] sm:$0xff]  ;;  %v1609_v8 = vld [vmem:[#allocation2 + $0xa8] sm:$0xff]  ;;  %v1480_v10 = vpop.permute.xlu1 %1479  ;;  %v1482_v18 = vpop.permute.xlu0 %1481 }
 0x23d   :  { %1347 = vst [vmem:[#allocation2 + $0x1e0] sm:$0xf] %v1331_v2  ;;  %1348 = vst [vmem:[#allocation2 + $0x1e8] sm:$0xf] %v1332_v17  ;;  %v1310_v49 = vmul.f32 %v1294_v53, %v1257_v55  ;;  %v2615_v48 = vpack.c.bf16 %v1636_v23, %v1620_v30  ;;  %v1526_v4 = vrot.slane %v3092_v33, %v3261_v0  ;;  %v1443_v46 = vrot.slane %v1427_v1, 4  ;;  %v1593_v53 = vld [vmem:[#allocation2 + $0x28] sm:$0xff] }
 0x23e   :  { %v1444_v9 = vrot.slane %v1428_v24, 4  ;;  %1467 = vst [vmem:[#allocation2 + $0x1f0] sm:$0xf0] %v1427_v1  ;;  %1468 = vst [vmem:[#allocation2 + $0x1f8] sm:$0xf0] %v1428_v24  ;;  %v1333_v15 = vrot.slane %v1309_v21, 4  ;;  %v2635_v11 = vpack.c.bf16 %v1610_v7, %v1594_v31  ;;  %v1488_v58 = vsel %vm1485_vm6, %v3222_v14, %v1480_v10 }
 0x23f   :  { %1317 = vst [vmem:[#allocation2 + $0x1b0] sm:$0xf] %v1309_v21  ;;  %1318 = vst [vmem:[#allocation2 + $0x1b8] sm:$0xf] %v1310_v49  ;;  %v1334_v63 = vrot.slane %v1310_v49, 4  ;;  %2616 = vmatpush1.bf16.msra.mxu0 %v2615_v48  ;;  %v1487_v0 = vsel %vm1485_vm6, %v1480_v10, %v1482_v18  ;;  %v1530_v41 = vrot.slane %v3092_v33, %v3235_v43  ;;  %v1592_v14 = vld [vmem:[#allocation2 + $0x20] sm:$0xff] }
 0x240   :  { %v1653_v19 = vld [vmem:[#allocation2 + $0x208] sm:$0xf]  ;;  %1459 = vst [vmem:[#allocation2 + $0x1b0] sm:$0xf0] %v1443_v46  ;;  %1460 = vst [vmem:[#allocation2 + $0x1b8] sm:$0xf0] %v1444_v9  ;;  %v1543_v6 = vmul.f32 %v1518_v26, %v1488_v58  ;;  %v1544_v37 = vmul.f32 %v1522_v59, %v1487_v0  ;;  %2636 = vmatpush1.bf16.msra.mxu1 %v2635_v11  ;;  %v2625_v28 = vpack.c.bf16 %v1609_v8, %v1593_v53  ;;  %v1484_v43 = vpop.permute.xlu1 %1483 }
 0x241   :  { %1349 = vst [vmem:[#allocation2 + $0x1f0] sm:$0xf] %v1333_v15  ;;  %2329 = vmatprep.subr.msk.mxu0 %vm1678_vm8, %v1653_v19  ;;  %1350 = vst [vmem:[#allocation2 + $0x1f8] sm:$0xf] %v1334_v63  ;;  %v1608_v50 = vld [vmem:[#allocation2 + $0xa0] sm:$0xff]  ;;  %v1486_v52 = vsel %vm1485_vm6, %v1482_v18, %v1484_v43  ;;  %v1493_v33 = vsel %vm1485_vm6, %v1484_v43, %v2979_v42  ;;  %v1625_v26 = vld [vmem:[#allocation2 + $0x128] sm:$0xff] }
 0x242   :  { %1551 = vst [vmem:[#allocation2 + $0x220] sm:$0xf] %v1543_v6  ;;  %v1567_v16 = vrot.slane %v1543_v6, 4  ;;  %1552 = vst [vmem:[#allocation2 + $0x228] sm:$0xf] %v1544_v37  ;;  %v1568_v54 = vrot.slane %v1544_v37, 4  ;;  %v2627_v45 = vpack.c.bf16 %v1608_v50, %v1592_v14  ;;  %v1545_v29 = vmul.f32 %v1526_v4, %v1486_v52 }
 0x243   :  { %2330 = vmatpush1.msk.msra.mxu0 %vm1678_vm8, %v1652_v39  ;;  %v1641_v5 = vld [vmem:[#allocation2 + $0x1a8] sm:$0xff]  ;;  %v1640_v38 = vld [vmem:[#allocation2 + $0x1a0] sm:$0xff]  ;;  %v1546_v34 = vmul.f32 %v1530_v41, %v1493_v33  ;;  %v1627_v51 = vld [vmem:[#allocation2 + $0x138] sm:$0xff] }
 0x244   :  { %1583 = vst [vmem:[#allocation2 + $0x260] sm:$0xf] %v1567_v16  ;;  %1584 = vst [vmem:[#allocation2 + $0x268] sm:$0xf] %v1568_v54  ;;  %2626 = vmatprep.subr.bf16.mxu0 %v2625_v28  ;;  %2331 = vmatmul.mubr.msk.f32.vlgmr.msra.gmra.mrb[4].mxu0 %vm1674_vm9, %v3266_v32  ;;  %v2629_v40 = vpack.c.bf16 %v1641_v5, %v1625_v26  ;;  %v1624_v56 = vld [vmem:[#allocation2 + $0x120] sm:$0xff]  ;;  %v1569_v36 = vrot.slane %v1545_v29, 4 }
 0x245   :  { %2628 = vmatpush1.bf16.msra.mxu0 %v2627_v45  ;;  %v2631_v57 = vpack.c.bf16 %v1640_v38, %v1624_v56  ;;  %1933 = vmatprep.mubr.f32.mxu0 %v2797_v22  ;;  %1553 = vst [vmem:[#allocation2 + $0x230] sm:$0xf] %v1545_v29  ;;  %1554 = vst [vmem:[#allocation2 + $0x238] sm:$0xf] %v1546_v34  ;;  %v1570_v42 = vrot.slane %v1546_v34, 4  ;;  %v1626_v3 = vld [vmem:[#allocation2 + $0x130] sm:$0xff] }
 0x246   :  { %2630 = vmatprep.subr.bf16.mxu0 %v2629_v40  ;;  %1585 = vst [vmem:[#allocation2 + $0x270] sm:$0xf] %v1569_v36  ;;  %v1613_v60 = vld [vmem:[#allocation2 + $0xc8] sm:$0xff]  ;;  %v1612_v2 = vld [vmem:[#allocation2 + $0xc0] sm:$0xff]  ;;  %v1615_v44 = vld [vmem:[#allocation2 + $0xd8] sm:$0xff] }
 0x247   :  { %v1643_v13 = vld [vmem:[#allocation2 + $0x1b8] sm:$0xff]  ;;  %v1642_v20 = vld [vmem:[#allocation2 + $0x1b0] sm:$0xff]  ;;  %1586 = vst [vmem:[#allocation2 + $0x278] sm:$0xf] %v1570_v42  ;;  %v1597_v17 = vld [vmem:[#allocation2 + $0x48] sm:$0xff] }
 0x248   :  { %v2637_v25 = vpack.c.bf16 %v1643_v13, %v1627_v51  ;;  %v2639_v62 = vpack.c.bf16 %v1642_v20, %v1626_v3  ;;  %v2641_v35 = vpack.c.bf16 %v1613_v60, %v1597_v17  ;;  %v1596_v23 = vld [vmem:[#allocation2 + $0x40] sm:$0xff]  ;;  %v1629_v61 = vld [vmem:[#allocation2 + $0x148] sm:$0xff]  ;;  %v1614_v55 = vld [vmem:[#allocation2 + $0xd0] sm:$0xff] }
 0x249   :  { %2632 = vmatpush1.bf16.msra.mxu0 %v2631_v57  ;;  %v1657_v59 = vld [vmem:[#allocation2 + $0x228] sm:$0xf]  ;;  %v1656_v27 = vld [vmem:[#allocation2 + $0x220] sm:$0xf]  ;;  %v2643_v12 = vpack.c.bf16 %v1612_v2, %v1596_v23  ;;  %v2645_v21 = vpack.c.bf16 %v1645_v47, %v1629_v61  ;;  %v1599_v30 = vld [vmem:[#allocation2 + $0x58] sm:$0xff] }
 0x24a   :  { %2335 = vmatprep.subr.msk.mxu0 %vm1678_vm8, %v1657_v59  ;;  %2638 = vmatprep.subr.bf16.mxu1 %v2637_v25  ;;  %v1644_v49 = vld [vmem:[#allocation2 + $0x1c0] sm:$0xff]  ;;  %v1647_v48 = vld [vmem:[#allocation2 + $0x1d8] sm:$0xff]  ;;  %v2649_v31 = vpack.c.bf16 %v1615_v44, %v1599_v30  ;;  %v1598_v7 = vld [vmem:[#allocation2 + $0x50] sm:$0xff] }
 0x24b   :  { %2640 = vmatpush1.bf16.msra.mxu1 %v2639_v62  ;;  %v1628_v8 = vld [vmem:[#allocation2 + $0x140] sm:$0xff]  ;;  %v2651_v4 = vpack.c.bf16 %v1614_v55, %v1598_v7  ;;  %v1631_v46 = vld [vmem:[#allocation2 + $0x158] sm:$0xff]  ;;  %v1646_v10 = vld [vmem:[#allocation2 + $0x1d0] sm:$0xff] }
 0x24c   :  { %v1659_v1 = vld [vmem:[#allocation2 + $0x238] sm:$0xf]  ;;  %v1658_v24 = vld [vmem:[#allocation2 + $0x230] sm:$0xf]  ;;  %v2647_v9 = vpack.c.bf16 %v1644_v49, %v1628_v8  ;;  %v2653_v15 = vpack.c.bf16 %v1647_v48, %v1631_v46  ;;  %v1661_v18 = vld [vmem:[#allocation2 + $0x248] sm:$0xf] }
 0x24d   :  { %2336 = vmatpush1.msk.msra.mxu0 %vm1678_vm8, %v1656_v27  ;;  %2338 = vmatprep.subr.msk.mxu1 %vm1678_vm8, %v1659_v1  ;;  %v1630_v11 = vld [vmem:[#allocation2 + $0x150] sm:$0xff]  ;;  %v1617_v63 = vld [vmem:[#allocation2 + $0xe8] sm:$0xff]  ;;  %v1600_v58 = vld [vmem:[#allocation2 + $0x60] sm:$0xff] }
 0x24e   :  { %2642 = vmatprep.subr.bf16.mxu0 %v2641_v35  ;;  %2337 = vmatmul.mubr.msk.f32.vlgmr.msra.gmra.mrb[6].mxu0 %vm1674_vm9, %v3266_v32  ;;  %v2655_v19 = vpack.c.bf16 %v1646_v10, %v1630_v11  ;;  %v1660_v0 = vld [vmem:[#allocation2 + $0x240] sm:$0xf]  ;;  %v1601_v53 = vld [vmem:[#allocation2 + $0x68] sm:$0xff]  ;;  %v1663_v6 = vld [vmem:[#allocation2 + $0x258] sm:$0xf] }
 0x24f   :  { %2644 = vmatpush1.bf16.msra.mxu0 %v2643_v12  ;;  %2339 = vmatpush1.msk.msra.mxu1 %vm1678_vm8, %v1658_v24  ;;  %v1649_v41 = vld [vmem:[#allocation2 + $0x1e8] sm:$0xff]  ;;  %v2657_v37 = vpack.c.bf16 %v1617_v63, %v1601_v53  ;;  %v1616_v28 = vld [vmem:[#allocation2 + $0xe0] sm:$0xff]  ;;  %v1619_v14 = vld [vmem:[#allocation2 + $0xf8] sm:$0xff] }
 0x250   :  { %2646 = vmatprep.subr.bf16.mxu0 %v2645_v21  ;;  %2340 = vmatmul.mubr.msk.f32.vlgmr.msra.gmra.mrb[6].mxu1 %vm1674_vm9, %v3266_v32  ;;  %v2659_v16 = vpack.c.bf16 %v1616_v28, %v1600_v58  ;;  %v1633_v54 = vld [vmem:[#allocation2 + $0x168] sm:$0xff]  ;;  %v1618_v39 = vld [vmem:[#allocation2 + $0xf0] sm:$0xff]  ;;  %v1603_v50 = vld [vmem:[#allocation2 + $0x78] sm:$0xff] }
 0x251   :  { %2650 = vmatprep.subr.bf16.mxu1 %v2649_v31  ;;  %2075 = vmatprep.mubr.f32.mxu0 %v2797_v22  ;;  %v2661_v43 = vpack.c.bf16 %v1649_v41, %v1633_v54  ;;  %v1648_v52 = vld [vmem:[#allocation2 + $0x1e0] sm:$0xff]  ;;  %v1651_v33 = vld [vmem:[#allocation2 + $0x1f8] sm:$0xff]  ;;  %v1662_v45 = vld [vmem:[#allocation2 + $0x250] sm:$0xf]  ;;  %v2665_v26 = vpack.c.bf16 %v1619_v14, %v1603_v50 }
 0x252   :  { %2652 = vmatpush1.bf16.msra.mxu1 %v2651_v4  ;;  %2146 = vmatprep.mubr.f32.mxu1 %v2797_v22  ;;  %v1602_v5 = vld [vmem:[#allocation2 + $0x70] sm:$0xff]  ;;  %v1632_v38 = vld [vmem:[#allocation2 + $0x160] sm:$0xff]  ;;  %v1635_v34 = vld [vmem:[#allocation2 + $0x178] sm:$0xff] }
 0x253   :  { %2648 = vmatpush1.bf16.msra.mxu0 %v2647_v9  ;;  %2654 = vmatprep.subr.bf16.mxu1 %v2653_v15  ;;  %v2667_v29 = vpack.c.bf16 %v1618_v39, %v1602_v5  ;;  %v2663_v40 = vpack.c.bf16 %v1648_v52, %v1632_v38  ;;  %v2669_v56 = vpack.c.bf16 %v1651_v33, %v1635_v34  ;;  %v1650_v57 = vld [vmem:[#allocation2 + $0x1f0] sm:$0xff]  ;;  %v1665_v36 = vld [vmem:[#allocation2 + $0x268] sm:$0xf]  ;;  %v1664_v13 = vld [vmem:[#allocation2 + $0x260] sm:$0xf] }
 0x254   :  { %2341 = vmatprep.subr.msk.mxu0 %vm1678_vm8, %v1661_v18  ;;  %v1634_v42 = vld [vmem:[#allocation2 + $0x170] sm:$0xff]  ;;  %v1667_v3 = vld [vmem:[#allocation2 + $0x278] sm:$0xf] }
 0x255   :  { %v2671_v51 = vpack.c.bf16 %v1650_v57, %v1634_v42  ;;  %v1666_v20 = vld [vmem:[#allocation2 + $0x270] sm:$0xf] }
 0x256   :  { %2656 = vmatpush1.bf16.msra.mxu1 %v2655_v19 }
 0x257   :  { %2342 = vmatpush1.msk.msra.mxu0 %vm1678_vm8, %v1660_v0  ;;  %2344 = vmatprep.subr.msk.mxu1 %vm1678_vm8, %v1663_v6 }
 0x258   :  { %2658 = vmatprep.subr.bf16.mxu0 %v2657_v37  ;;  %2343 = vmatmul.mubr.msk.f32.vlgmr.msra.gmra.mrb[8].mxu0 %vm1674_vm9, %v3266_v32 }
 0x259   :  { %2660 = vmatpush1.bf16.msra.mxu0 %v2659_v16  ;;  %2217 = vmatprep.mubr.f32.mxu0 %v2797_v22 }
 0x25a   :  { %2662 = vmatprep.subr.bf16.mxu0 %v2661_v43  ;;  %2345 = vmatpush1.msk.msra.mxu1 %vm1678_vm8, %v1662_v45 }
 0x25b   :  { %2346 = vmatmul.mubr.msk.f32.vlgmr.msra.gmra.mrb[8].mxu1 %vm1674_vm9, %v3266_v32  ;;  %2666 = vmatprep.subr.bf16.mxu1 %v2665_v26 }
 0x25c   :  { %2668 = vmatpush1.bf16.msra.mxu1 %v2667_v29  ;;  %2288 = vmatprep.mubr.f32.mxu1 %v2797_v22  ;;  %v1672_v22 = vpop.permute.xlu0 %1671 }
 0x25d   :  { %2664 = vmatpush1.bf16.msra.mxu0 %v2663_v40  ;;  %2670 = vmatprep.subr.bf16.mxu1 %v2669_v56 }
 0x25e   :  { %2347 = vmatprep.subr.msk.mxu0 %vm1678_vm8, %v1665_v36 }
 0x260   :  { %2672 = vmatpush1.bf16.msra.mxu1 %v2671_v51 }
 0x261   :  { %2348 = vmatpush1.msk.msra.mxu0 %vm1678_vm8, %v1664_v13  ;;  %2350 = vmatprep.subr.msk.mxu1 %vm1678_vm8, %v1667_v3 }
 0x262   :  { %2349 = vmatmul.mubr.msk.f32.vlgmr.msra.gmra.mrb[10].mxu0 %vm1674_vm9, %v3266_v32 }
 0x264   :  { %2351 = vmatpush1.msk.msra.mxu1 %vm1678_vm8, %v1666_v20 }
 0x265   :  { %2352 = vmatmul.mubr.msk.f32.vlgmr.msra.gmra.mrb[10].mxu1 %vm1674_vm9, %v3266_v32 }
 0x2f5   :  { %v1864_v25 = vpop.f32.mrb[4].mxu1 }
 0x2f6   :  { %v1866_v62 = vpop.f32.mrb[5].mxu1  ;;  %v1865_v59 = vadd.f32 %v1864_v25, %v1672_v22 }
 0x2f7   :  { %v1867_v60 = vadd.f32 %v1866_v62, %v1672_v22 }
 0x2f8   :  { %2297 = vst [vmem:[#allocation9 + $0x10] sm:$0xff] %v1865_v59 }
 0x2f9   :  { %2298 = vst [vmem:[#allocation9 + $0x18] sm:$0xff] %v1867_v60 }
 0x317   :  { %v1793_v27 = vpop.f32.mrb[4].mxu0 }
 0x318   :  { %v1794_v2 = vadd.f32 %v1793_v27, %v1672_v22  ;;  %v1795_v17 = vpop.f32.mrb[5].mxu0 }
 0x319   :  { %v1796_v47 = vadd.f32 %v1795_v17, %v1672_v22 }
 0x31a   :  { %2295 = vst [vmem:[#allocation9] sm:$0xff] %v1794_v2 }
 0x31b   :  { %2296 = vst [vmem:[#allocation9 + $0x8] sm:$0xff] %v1796_v47 }
 0x321   :  { %v1935_v35 = vpop.f32.mrb[6].mxu0 }
 0x322   :  { %v1936_v23 = vadd.f32 %v1935_v35, %v1672_v22  ;;  %v1937_v61 = vpop.f32.mrb[7].mxu0 }
 0x323   :  { %v1938_v44 = vadd.f32 %v1937_v61, %v1672_v22  ;;  %v2006_v12 = vpop.f32.mrb[6].mxu1 }
 0x324   :  { %2299 = vst [vmem:[#allocation9 + $0x20] sm:$0xff] %v1936_v23  ;;  %v2007_v32 = vadd.f32 %v2006_v12, %v1672_v22  ;;  %v2008_v1 = vpop.f32.mrb[7].mxu1 }
 0x325   :  { %2300 = vst [vmem:[#allocation9 + $0x28] sm:$0xff] %v1938_v44  ;;  %v2009_v24 = vadd.f32 %v2008_v1, %v1672_v22 }
 0x326   :  { %2301 = vst [vmem:[#allocation9 + $0x30] sm:$0xff] %v2007_v32 }
 0x327   :  { %2302 = vst [vmem:[#allocation9 + $0x38] sm:$0xff] %v2009_v24 }
 0x32b   :  { %v2077_v55 = vpop.f32.mrb[8].mxu0 }
 0x32c   :  { %v2078_v21 = vadd.f32 %v2077_v55, %v1672_v22  ;;  %v2079_v30 = vpop.f32.mrb[9].mxu0 }
 0x32d   :  { %v2080_v49 = vadd.f32 %v2079_v30, %v1672_v22 }
 0x32e   :  { %2303 = vst [vmem:[#allocation9 + $0x40] sm:$0xff] %v2078_v21  ;;  %v2148_v48 = vpop.f32.mrb[8].mxu1 }
 0x32f   :  { %v2149_v31 = vadd.f32 %v2148_v48, %v1672_v22  ;;  %2304 = vst [vmem:[#allocation9 + $0x48] sm:$0xff] %v2080_v49  ;;  %v2150_v7 = vpop.f32.mrb[9].mxu1 }
 0x330   :  { %v2151_v8 = vadd.f32 %v2150_v7, %v1672_v22 }
 0x331   :  { %2305 = vst [vmem:[#allocation9 + $0x50] sm:$0xff] %v2149_v31 }
 0x332   :  { %2306 = vst [vmem:[#allocation9 + $0x58] sm:$0xff] %v2151_v8 }
 0x335   :  { %v2219_v4 = vpop.f32.mrb[10].mxu0 }
 0x336   :  { %v2220_v46 = vadd.f32 %v2219_v4, %v1672_v22  ;;  %v2221_v9 = vpop.f32.mrb[11].mxu0 }
 0x337   :  { %v2222_v15 = vadd.f32 %v2221_v9, %v1672_v22 }
 0x338   :  { %2307 = vst [vmem:[#allocation9 + $0x60] sm:$0xff] %v2220_v46  ;;  %v2290_v10 = vpop.f32.mrb[10].mxu1 }
 0x339   :  { %2308 = vst [vmem:[#allocation9 + $0x68] sm:$0xff] %v2222_v15  ;;  %v2291_v18 = vadd.f32 %v2290_v10, %v1672_v22  ;;  %v2292_v11 = vpop.f32.mrb[11].mxu1 }
 0x33a   :  { %v2293_v63 = vadd.f32 %v2292_v11, %v1672_v22 }
 0x33b   :  { %2309 = vst [vmem:[#allocation9 + $0x70] sm:$0xff] %v2291_v18 }
 0x33c   :  { %2310 = vst [vmem:[#allocation9 + $0x78] sm:$0xff] %v2293_v63 }
 0x33d   :  { %2767 = shalt.err (!%p2764_p0)
}
 0x33e   :  { %s2768_s19 = scalar_lea.hbm %s3484_s5, 2048 }
 0x33f   :  { %p2769_p1 = scmp.ne.s32.totalorder %s3484_s5, %s2768_s19  ;;  %p2772_p2 = scmp.lt.u32.totalorder %s2768_s19, %s3484_s5 }
 0x341   :  { %p2774_p3 = pnand %p2772_p2, %p2769_p1 }
 0x343   :  { %2777 = shalt.err (!%p2774_p3)
}
 0x344   :  { %2322 = dma.vmem_to_hbm [thread:$0]  %s2317_s16, 2048, %s3484_s5, [#allocation5], %s2785_s28, %s2785_s28, %s2786_s29  }
 0x345   :  { %2782 = dma.done.wait [#allocation5], 2048  }
 0x346   :  { %2783 = vsyncadd [#allocation5], 4294965248 }
 0x347   :  { %2326 = vsyncpa [#allocation4], 1 }
 0x348   :  { %2327 = vsyncpa [#allocation7], 1 }
 0x349   :  { %2328 = vsyncpa [#allocation5], 1 }

</bundles_post_ra>
